<compile_context>
chip_gen: v5e
topology: v5e:2x2
jax: 0.10.0
libtpu: 0.0.40
codegen_flags: <defaults>
</compile_context>

<pallas_src>
import functools

import jax
import jax.numpy as jnp
from jax.experimental import pallas as pl
from jax.experimental.pallas import tpu as pltpu


def _vmem_cap_bytes():
    try:
        return int(pltpu.get_tpu_info().vmem_capacity_bytes) * 3 // 4
    except Exception:
        return 48 * 1024 * 1024


_VMEM_CAP = _vmem_cap_bytes()


def _cparams(semantics, est_bytes):
    # Analytic per-call VMEM cap (double-buffered blocks + resident weights +
    # compute temporaries + slack), clamped to 3/4 of physical VMEM.
    lim = min(_VMEM_CAP, max(32 * 1024 * 1024, int(4 * est_bytes) + (16 << 20)))
    return pltpu.CompilerParams(dimension_semantics=semantics,
                                vmem_limit_bytes=int(lim))


def _silu(y):
    # SiLU; the divide rides the EUP (approx reciprocal) instead of the VALU.
    return y * pl.reciprocal(1.0 + jnp.exp(-y), approx=True)


# ----------------------------------------------------------------------------
# Kernel A: split-K 1x1 Conv + folded-BN bias + SiLU.
#   out(Cout, bc) = SiLU( sum_i W_i(Cout,Cin_i) @ X_i(Cin_i,bc) + bias )
# ----------------------------------------------------------------------------
def _make_mm_bias_silu_kernel(n_inputs):
    def kernel(*refs):
        xs = refs[:n_inputs]
        ws = refs[n_inputs:2 * n_inputs]
        b_ref = refs[2 * n_inputs]
        o_ref = refs[2 * n_inputs + 1]
        acc = jnp.dot(ws[0][...], xs[0][0], preferred_element_type=jnp.float32)
        for i in range(1, n_inputs):
            acc = acc + jnp.dot(ws[i][...], xs[i][0],
                                preferred_element_type=jnp.float32)
        y = acc + b_ref[...]                       # folded-BN bias (f32)
        o_ref[0] = _silu(y).astype(o_ref.dtype)
    return kernel


def conv1x1_bn_silu(xs, ws, bias, *, out_dtype=jnp.bfloat16, block_cols=1024):
    """Split-K 1x1 Conv+BN+SiLU.

    xs : list of (N, Cin_i, HW) bf16 activations (channels-first per image,
         spatial flattened onto the lane axis).
    ws : list of (Cout, Cin_i) bf16 weights with the BN scale pre-folded.
    bias: (Cout, 1) f32 folded-BN bias.
    Returns (N, Cout, HW) in out_dtype (bf16 intermediates; f32 only for cv7).
    """
    N, _, HW = xs[0].shape
    Cout = ws[0].shape[0]
    bc = HW if HW <= block_cols else block_cols        # block_cols % 128 == 0
    grid = (N, pl.cdiv(HW, bc))

    in_specs = (
        [pl.BlockSpec((1, x.shape[1], bc), lambda n, j: (n, 0, j)) for x in xs]
        # weights / bias: constant index map -> resident in VMEM across the grid
        + [pl.BlockSpec(w.shape, lambda n, j: (0, 0)) for w in ws]
        + [pl.BlockSpec((Cout, 1), lambda n, j: (0, 0))]
    )
    out_spec = pl.BlockSpec((1, Cout, bc), lambda n, j: (n, 0, j))

    k_total = sum(int(x.shape[1]) for x in xs)
    est = (2 * k_total * bc * 2                       # double-buffered X blocks
           + sum(int(w.size) * 2 for w in ws) + Cout * 4
           + 2 * Cout * bc * jnp.dtype(out_dtype).itemsize
           + Cout * bc * 4)                           # f32 accumulator

    return pl.pallas_call(
        _make_mm_bias_silu_kernel(len(xs)),
        out_shape=jax.ShapeDtypeStruct((N, Cout, HW), out_dtype),
        grid_spec=pltpu.PrefetchScalarGridSpec(
            num_scalar_prefetch=0, grid=grid,
            in_specs=in_specs, out_specs=out_spec),
        compiler_params=_cparams(("parallel", "parallel"), est),
    )(*xs, *ws, bias)


# ----------------------------------------------------------------------------
# Kernel B: direct 3x3 stride-1 'same' Conv + BN + SiLU (no HBM im2col).
# The zero-padded canvas of one image is flattened row-major, so every tap is
# a contiguous lane-offset slice of the VMEM-resident canvas.
# ----------------------------------------------------------------------------
def _conv3x3_kernel(xf_ref, w_ref, b_ref, o_ref, *, Wp, Lo):
    # xf_ref: (1, Cin, Lc)   zero-padded flattened canvas, Lc = (H+2)*Wp + 2
    # w_ref : (9, Cout, Cin) BN-scale-folded bf16 weights, tap t = dy*3 + dx
    # b_ref : (Cout, 1) f32
    # o_ref : (1, Cout, Lo)  Lo = H*Wp (2 seam cols/row dropped by the wrapper)
    acc = jnp.dot(w_ref[0], xf_ref[0, :, 0:Lo],
                  preferred_element_type=jnp.float32)
    for t in range(1, 9):
        off = (t // 3) * Wp + (t % 3)
        acc = acc + jnp.dot(w_ref[t], xf_ref[0, :, off:off + Lo],
                            preferred_element_type=jnp.float32)
    o_ref[0] = _silu(acc + b_ref[...]).astype(o_ref.dtype)


def conv3x3_bn_silu(x, w9, bias, H, W, *, out_dtype=jnp.bfloat16):
    """x: (N, Cin, H*W) bf16; w9: (9, Cout, Cin) bf16 (BN scale folded)."""
    N, C, HW = x.shape
    Cout = w9.shape[1]
    Hp, Wp = H + 2, W + 2
    Lc = Hp * Wp + 2           # +2 so the (dy=2, dx=2) tap slice stays in bounds
    Lo = H * Wp

    canvas = jnp.pad(x.reshape(N, C, H, W), ((0, 0), (0, 0), (1, 1), (1, 1)))
    canvas = jnp.pad(canvas.reshape(N, C, Hp * Wp), ((0, 0), (0, 0), (0, 2)))

    est = (2 * C * Lc * 2 + 9 * Cout * C * 2 + Cout * 4
           + 2 * Cout * Lo * 2 + Cout * Lo * 4)

    out = pl.pallas_call(
        functools.partial(_conv3x3_kernel, Wp=Wp, Lo=Lo),
        out_shape=jax.ShapeDtypeStruct((N, Cout, Lo), out_dtype),
        grid_spec=pltpu.PrefetchScalarGridSpec(
            num_scalar_prefetch=0, grid=(N,),
            in_specs=[pl.BlockSpec((1, C, Lc), lambda n: (n, 0, 0)),
                      pl.BlockSpec((9, Cout, C), lambda n: (0, 0, 0)),
                      pl.BlockSpec((Cout, 1), lambda n: (0, 0))],
            out_specs=pl.BlockSpec((1, Cout, Lo), lambda n: (n, 0, 0))),
        compiler_params=_cparams(("parallel",), est),
    )(canvas, w9, bias)
    # Drop the Wp-W seam columns -> compact (N, Cout, H*W).
    return out.reshape(N, Cout, H, Wp)[:, :, :, :W].reshape(N, Cout, HW)


# ----------------------------------------------------------------------------
# Kernel C: fused MaxPool(5,1,2) chain on a single -inf padded flat canvas.
# Emits only [pool(x), pool^2(x), pool^3(x)]; x itself is fed to cv5 via
# split-K, so it is never duplicated in HBM.  Stores are lane-dense (H*Wc).
# ----------------------------------------------------------------------------
def _spp_pool_kernel(xf_ref, o_ref, *, Wc, Lo, k, C):
    # xf_ref: (1, C, Lc)  -inf padded canvas (pad = 3*(k//2)), flattened rows
    # o_ref : (1, 3*C, Lo) with Lo = H*Wc (seam cols dropped by the wrapper)
    r = k // 2
    xv = xf_ref[0]                                       # (C, Lc)

    def vpool(a, n_out):
        # Separable k x k "valid" max on the flat canvas: k lane-shift maxes,
        # then k row-stride (Wc) shift maxes.
        nr = n_out + (k - 1) * Wc
        rm = a[:, 0:nr]
        for dx in range(1, k):
            rm = jnp.maximum(rm, a[:, dx:dx + nr])
        out = rm[:, 0:n_out]
        for dy in range(1, k):
            out = jnp.maximum(out, rm[:, dy * Wc:dy * Wc + n_out])
        return out

    L1 = Lo + 2 * (k - 1) * (Wc + 1)
    L2 = Lo + (k - 1) * (Wc + 1)
    p1 = vpool(xv, L1)           # chained valid pools of the -inf canvas
    p2 = vpool(p1, L2)
    p3 = vpool(p2, Lo)
    o_ref[0, 0 * C:1 * C, :] = p1[:, 2 * r * (Wc + 1):2 * r * (Wc + 1) + Lo]
    o_ref[0, 1 * C:2 * C, :] = p2[:, r * (Wc + 1):r * (Wc + 1) + Lo]
    o_ref[0, 2 * C:3 * C, :] = p3


def spp_pool_chain(x, H, W, k=5):
    """x: (N, C, H*W) bf16 -> (N, 3*C, H*W) bf16 = [pool, pool^2, pool^3]."""
    N, C, HW = x.shape
    r = k // 2
    pad = 3 * r
    Hc, Wc = H + 2 * pad, W + 2 * pad
    Lo = H * Wc
    tail = 3 * (k - 1)                         # keeps the deepest slices in bounds
    Lc = Hc * Wc + tail

    canvas = jnp.pad(x.reshape(N, C, H, W),
                     ((0, 0), (0, 0), (pad, pad), (pad, pad)),
                     constant_values=-jnp.inf)
    canvas = jnp.pad(canvas.reshape(N, C, Hc * Wc), ((0, 0), (0, 0), (0, tail)),
                     constant_values=-jnp.inf)

    est = 2 * C * Lc * 2 + 2 * 3 * C * Lo * 2 + 4 * C * Lc * 2

    out = pl.pallas_call(
        functools.partial(_spp_pool_kernel, Wc=Wc, Lo=Lo, k=k, C=C),
        out_shape=jax.ShapeDtypeStruct((N, 3 * C, Lo), x.dtype),
        grid_spec=pltpu.PrefetchScalarGridSpec(
            num_scalar_prefetch=0, grid=(N,),
            in_specs=[pl.BlockSpec((1, C, Lc), lambda n: (n, 0, 0))],
            out_specs=pl.BlockSpec((1, 3 * C, Lo), lambda n: (n, 0, 0))),
        compiler_params=_cparams(("parallel",), est),
    )(canvas)
    # TODO(synk): add a channel-block grid axis (megacore) and pltpu.roll-based
    # shifts for large C / feature maps; unnecessary at these sizes.
    return out.reshape(N, 3 * C, H, Wc)[:, :, :, :W].reshape(N, 3 * C, HW)


# ----------------------------------------------------------------------------
# Parameter init (deterministic, synthetic) and host-side preparation
# ----------------------------------------------------------------------------
def _make_conv_params(key, cin, cout, k):
    k1, k2, k3, k4, k5 = jax.random.split(key, 5)
    w = jax.random.normal(k1, (k, k, cin, cout), jnp.float32)
    w = w * (1.0 / (k * k * cin)) ** 0.5
    gamma = jax.random.uniform(k2, (cout,), jnp.float32, 0.5, 1.5)
    beta = jax.random.normal(k3, (cout,), jnp.float32) * 0.1
    mean = jax.random.normal(k4, (cout,), jnp.float32) * 0.1
    var = jax.random.uniform(k5, (cout,), jnp.float32, 0.5, 1.5)
    eps = 1e-5
    scale = gamma / jnp.sqrt(var + eps)
    bias = beta - mean * scale
    return {"w": w, "scale": scale, "bias": bias}


def init_sppfcspc_params(key, c1, c2, e=0.5):
    c_ = int(2 * c2 * e)
    ks = jax.random.split(key, 7)
    return {
        "cv1": _make_conv_params(ks[0], c1, c_, 1),
        "cv2": _make_conv_params(ks[1], c1, c_, 1),
        "cv3": _make_conv_params(ks[2], c_, c_, 3),
        "cv4": _make_conv_params(ks[3], c_, c_, 1),
        "cv5": _make_conv_params(ks[4], 4 * c_, c_, 1),
        "cv6": _make_conv_params(ks[5], c_, c_, 3),
        "cv7": _make_conv_params(ks[6], 2 * c_, c2, 1),
    }


def prepare_params(params):
    """Fold the (eval-mode) BN scale into the conv weights, reshuffle to the
    kernels' layouts and cast to bf16 ONCE, outside the jitted forward."""
    prep = {}
    for name, p in params.items():
        w = p["w"] * p["scale"]                          # (kh, kw, Cin, Cout)
        kh = w.shape[0]
        if kh == 1:
            w_cf = jnp.transpose(w[0, 0])                # (Cout, Cin)
        else:                                            # (9, Cout, Cin), t = dy*3+dx
            w_cf = jnp.transpose(w, (0, 1, 3, 2)).reshape(
                kh * kh, w.shape[3], w.shape[2])
        prep[name] = {"w": w_cf.astype(jnp.bfloat16),
                      "b": p["bias"].reshape(-1, 1).astype(jnp.float32)}
    return prep


# ----------------------------------------------------------------------------
# SPPFCSPC forward (Pallas), input/output NCHW to match PyTorch
# ----------------------------------------------------------------------------
def sppfcspc_forward(x_nchw, prep, k=5):
    N, C1, H, W = x_nchw.shape
    HW = H * W
    # NCHW -> (N, C, H*W) bf16 once; this is the layout every kernel consumes.
    x = x_nchw.reshape(N, C1, HW).astype(jnp.bfloat16)

    t = conv1x1_bn_silu([x], [prep["cv1"]["w"]], prep["cv1"]["b"])
    t = conv3x3_bn_silu(t, prep["cv3"]["w"], prep["cv3"]["b"], H, W)
    x1 = conv1x1_bn_silu([t], [prep["cv4"]["w"]], prep["cv4"]["b"])
    c_ = x1.shape[1]

    pooled = spp_pool_chain(x1, H, W, k)                 # (N, 3*c_, HW) bf16

    # cv5 on concat([x1, x2, x3, x4]) via split-K (no concat / x1 duplication).
    w5 = prep["cv5"]["w"]
    y = conv1x1_bn_silu([x1, pooled], [w5[:, :c_], w5[:, c_:]], prep["cv5"]["b"])
    y1 = conv3x3_bn_silu(y, prep["cv6"]["w"], prep["cv6"]["b"], H, W)
    y2 = conv1x1_bn_silu([x], [prep["cv2"]["w"]], prep["cv2"]["b"])

    # cv7 on concat([y1, y2]) via split-K; only this output is f32.
    w7 = prep["cv7"]["w"]
    out = conv1x1_bn_silu([y1, y2], [w7[:, :c_], w7[:, c_:]], prep["cv7"]["b"],
                          out_dtype=jnp.float32)
    # TODO(synk): fuse cv1->cv3->cv4 and cv5->cv6 into single pallas_calls with
    # VMEM-resident intermediates to cut per-call / HBM round-trip overhead.
    return out.reshape(N, out.shape[1], H, W)


# ----------------------------------------------------------------------------
# Pure-JAX reference emulating the same bf16-in / f32-accumulate numerics
# ----------------------------------------------------------------------------
def _ref_conv(x, p, *, final=False):
    w, scale, bias = p["w"], p["scale"], p["bias"]
    kh = w.shape[0]
    pad = kh // 2
    wb = (w * scale).astype(jnp.bfloat16).astype(jnp.float32)
    xb = x.astype(jnp.bfloat16).astype(jnp.float32)
    N, Cin, H, W = x.shape
    Cout = w.shape[-1]
    xp = jnp.pad(xb, ((0, 0), (0, 0), (pad, pad), (pad, pad)))
    acc = jnp.zeros((N, Cout, H, W), jnp.float32)
    for dy in range(kh):
        for dx in range(kh):
            acc = acc + jnp.einsum("nchw,cd->ndhw",
                                   xp[:, :, dy:dy + H, dx:dx + W], wb[dy, dx],
                                   precision=jax.lax.Precision.HIGHEST)
    y = acc + bias.reshape(1, -1, 1, 1)
    y = y * jax.nn.sigmoid(y)
    if not final:
        y = y.astype(jnp.bfloat16).astype(jnp.float32)    # kernels emit bf16
    return y


def _ref_pool(x, k):
    N, C, H, W = x.shape
    p = k // 2
    xp = jnp.pad(x, ((0, 0), (0, 0), (p, p), (p, p)), constant_values=-jnp.inf)
    m = xp[:, :, 0:H, 0:W]
    for dy in range(k):
        for dx in range(k):
            m = jnp.maximum(m, xp[:, :, dy:dy + H, dx:dx + W])
    return m


def sppfcspc_reference(x_nchw, params, k=5):
    x = x_nchw.astype(jnp.bfloat16).astype(jnp.float32)
    x1 = _ref_conv(_ref_conv(_ref_conv(x, params["cv1"]), params["cv3"]),
                   params["cv4"])
    x2 = _ref_pool(x1, k)
    x3 = _ref_pool(x2, k)
    x4 = _ref_pool(x3, k)
    y1 = _ref_conv(_ref_conv(jnp.concatenate([x1, x2, x3, x4], 1),
                             params["cv5"]), params["cv6"])
    y2 = _ref_conv(x, params["cv2"])
    return _ref_conv(jnp.concatenate([y1, y2], 1), params["cv7"], final=True)


# ----------------------------------------------------------------------------
if __name__ == "__main__":
    key = jax.random.PRNGKey(0)
    kx, kp = jax.random.split(key)

    N, c1_ch, c2_ch, Hs, Ws = 2, 4, 4, 16, 16      # x: (2, 4, 16, 16) NCHW
    x = jax.random.normal(kx, (N, c1_ch, Hs, Ws), jnp.float32)
    params = init_sppfcspc_params(kp, c1_ch, c2_ch)
    prep = prepare_params(params)

    fwd = jax.jit(sppfcspc_forward)
    out = jax.block_until_ready(fwd(x, prep))

    assert out.shape == (N, c2_ch, Hs, Ws), out.shape
    assert out.dtype == jnp.float32, out.dtype

    ref = sppfcspc_reference(x, params)
    max_err = float(jnp.max(jnp.abs(out - ref)))
    # bf16 activations + approx-reciprocal SiLU vs exact sigmoid reference:
    # structural bugs show up as O(1) errors, rounding noise stays well below.
    if not bool(jnp.allclose(out, ref, atol=5e-2, rtol=5e-2)):
        raise AssertionError(f"Pallas / reference mismatch, max abs err={max_err}")

    print("KERNEL_OK")
</pallas_src>

<mosaic_0001>
module attributes {stable_mosaic.version = 11 : i64} {
  func.func @kernel(%arg0: i32, %arg1: i32, %arg2: memref<1x4x256xbf16, #tpu.memory_space<vmem>>, %arg3: memref<4x4xbf16, #tpu.memory_space<vmem>>, %arg4: memref<4x1xf32, #tpu.memory_space<vmem>>, %arg5: memref<1x4x256xbf16, #tpu.memory_space<vmem>>) attributes {dimension_semantics = [#tpu.dimension_semantics<parallel>, #tpu.dimension_semantics<parallel>], iteration_bounds = array<i64: 2, 1>, scalar_prefetch = 0 : i64, scratch_operands = 0 : i64, tpu.core_type = #tpu.core_type<tc>, window_params = [{transform_indices = @transform_0, window_bounds = array<i64: 1, 4, 256>}, {pipeline_mode = #tpu.pipeline_mode<synchronous>, transform_indices = @transform_1, window_bounds = array<i64: 4, 4>}, {pipeline_mode = #tpu.pipeline_mode<synchronous>, transform_indices = @transform_2, window_bounds = array<i64: 4, 1>}, {transform_indices = @transform_3, window_bounds = array<i64: 1, 4, 256>}]} {
    %c0 = arith.constant 0 : index
    %c0_0 = arith.constant 0 : index
    %0 = vector.load %arg3[%c0, %c0_0] : memref<4x4xbf16, #tpu.memory_space<vmem>>, vector<4x4xbf16>
    %c0_1 = arith.constant 0 : index
    %c0_2 = arith.constant 0 : index
    %c0_3 = arith.constant 0 : index
    %1 = vector.load %arg2[%c0_1, %c0_2, %c0_3] : memref<1x4x256xbf16, #tpu.memory_space<vmem>>, vector<1x4x256xbf16>
    %2 = vector.shape_cast %1 : vector<1x4x256xbf16> to vector<4x256xbf16>
    %cst = arith.constant dense<0.000000e+00> : vector<4x256xf32>
    %3 = tpu.matmul %0, %2, %cst {dimension_numbers = #tpu.dot_dimension_numbers<[1], [0], [0], [1], [0, 0, 1, 1], [], []>} : vector<4x4xbf16>, vector<4x256xbf16>, vector<4x256xf32> -> vector<4x256xf32>
    %c0_4 = arith.constant 0 : index
    %c0_5 = arith.constant 0 : index
    %4 = vector.load %arg4[%c0_4, %c0_5] : memref<4x1xf32, #tpu.memory_space<vmem>>, vector<4x1xf32>
    %5 = vector.broadcast %4 : vector<4x1xf32> to vector<4x256xf32>
    %6 = arith.addf %3, %5 : vector<4x256xf32>
    %cst_6 = arith.constant 0.000000e+00 : f32
    %7 = vector.broadcast %cst_6 : f32 to vector<4x256xf32>
    %8 = arith.subf %7, %6 : vector<4x256xf32>
    %9 = math.exp %8 : vector<4x256xf32>
    %cst_7 = arith.constant 1.000000e+00 : f32
    %10 = vector.broadcast %cst_7 : f32 to vector<4x256xf32>
    %11 = arith.addf %10, %9 : vector<4x256xf32>
    %12 = tpu.reciprocal %11 {approx = true} : vector<4x256xf32> -> vector<4x256xf32>
    %13 = arith.mulf %6, %12 : vector<4x256xf32>
    %14 = arith.truncf %13 : vector<4x256xf32> to vector<4x256xbf16>
    %c0_8 = arith.constant 0 : index
    %c0_9 = arith.constant 0 : index
    %c0_10 = arith.constant 0 : index
    %15 = vector.load %arg5[%c0_8, %c0_9, %c0_10] : memref<1x4x256xbf16, #tpu.memory_space<vmem>>, vector<1x4x256xbf16>
    %16 = vector.shape_cast %15 : vector<1x4x256xbf16> to vector<4x256xbf16>
    %17 = vector.shape_cast %14 : vector<4x256xbf16> to vector<1x4x256xbf16>
    tpu.vector_store %arg5[%c0_8, %c0_9, %c0_10], %17 {strides = array<i32>} : memref<1x4x256xbf16, #tpu.memory_space<vmem>>, vector<1x4x256xbf16>,
    return
  }
  func.func @transform_0(%arg0: i32, %arg1: i32) -> (i32, i32, i32) {
    %c0_i32 = arith.constant 0 : i32
    %c0_i32_0 = arith.constant 0 : i32
    return %arg0, %c0_i32, %arg1 : i32, i32, i32
  }
  func.func @transform_1(%arg0: i32, %arg1: i32) -> (i32, i32) {
    %c0_i32 = arith.constant 0 : i32
    %c0_i32_0 = arith.constant 0 : i32
    %c0_i32_1 = arith.constant 0 : i32
    return %c0_i32, %c0_i32_0 : i32, i32
  }
  func.func @transform_2(%arg0: i32, %arg1: i32) -> (i32, i32) {
    %c0_i32 = arith.constant 0 : i32
    %c0_i32_0 = arith.constant 0 : i32
    %c0_i32_1 = arith.constant 0 : i32
    return %c0_i32, %c0_i32_0 : i32, i32
  }
  func.func @transform_3(%arg0: i32, %arg1: i32) -> (i32, i32, i32) {
    %c0_i32 = arith.constant 0 : i32
    %c0_i32_0 = arith.constant 0 : i32
    return %arg0, %c0_i32, %arg1 : i32, i32, i32
  }
}

module attributes {stable_mosaic.version = 11 : i64} {
  func.func @_conv3x3_kernel(%arg0: i32, %arg1: memref<1x4x326xbf16, #tpu.memory_space<vmem>>, %arg2: memref<9x4x4xbf16, #tpu.memory_space<vmem>>, %arg3: memref<4x1xf32, #tpu.memory_space<vmem>>, %arg4: memref<1x4x288xbf16, #tpu.memory_space<vmem>>) attributes {dimension_semantics = [#tpu.dimension_semantics<parallel>], iteration_bounds = array<i64: 2>, scalar_prefetch = 0 : i64, scratch_operands = 0 : i64, tpu.core_type = #tpu.core_type<tc>, window_params = [{transform_indices = @transform_0, window_bounds = array<i64: 1, 4, 326>}, {pipeline_mode = #tpu.pipeline_mode<synchronous>, transform_indices = @transform_1, window_bounds = array<i64: 9, 4, 4>}, {pipeline_mode = #tpu.pipeline_mode<synchronous>, transform_indices = @transform_2, window_bounds = array<i64: 4, 1>}, {transform_indices = @transform_3, window_bounds = array<i64: 1, 4, 288>}]} {
    %c0 = arith.constant 0 : index
    %c0_0 = arith.constant 0 : index
    %c0_1 = arith.constant 0 : index
    %0 = vector.load %arg2[%c0, %c0_0, %c0_1] : memref<9x4x4xbf16, #tpu.memory_space<vmem>>, vector<1x4x4xbf16>
    %1 = vector.shape_cast %0 : vector<1x4x4xbf16> to vector<4x4xbf16>
    %c0_2 = arith.constant 0 : index
    %c0_3 = arith.constant 0 : index
    %c0_4 = arith.constant 0 : index
    %2 = vector.load %arg1[%c0_2, %c0_3, %c0_4] : memref<1x4x326xbf16, #tpu.memory_space<vmem>>, vector<1x4x288xbf16>
    %3 = vector.shape_cast %2 : vector<1x4x288xbf16> to vector<4x288xbf16>
    %cst = arith.constant dense<0.000000e+00> : vector<4x288xf32>
    %4 = tpu.matmul %1, %3, %cst {dimension_numbers = #tpu.dot_dimension_numbers<[1], [0], [0], [1], [0, 0, 1, 1], [], []>} : vector<4x4xbf16>, vector<4x288xbf16>, vector<4x288xf32> -> vector<4x288xf32>
    %c1 = arith.constant 1 : index
    %c0_5 = arith.constant 0 : index
    %c0_6 = arith.constant 0 : index
    %5 = vector.load %arg2[%c1, %c0_5, %c0_6] : memref<9x4x4xbf16, #tpu.memory_space<vmem>>, vector<1x4x4xbf16>
    %6 = vector.shape_cast %5 : vector<1x4x4xbf16> to vector<4x4xbf16>
    %c0_7 = arith.constant 0 : index
    %c0_8 = arith.constant 0 : index
    %c1_9 = arith.constant 1 : index
    %7 = vector.load %arg1[%c0_7, %c0_8, %c1_9] : memref<1x4x326xbf16, #tpu.memory_space<vmem>>, vector<1x4x288xbf16>
    %8 = vector.shape_cast %7 : vector<1x4x288xbf16> to vector<4x288xbf16>
    %cst_10 = arith.constant dense<0.000000e+00> : vector<4x288xf32>
    %9 = tpu.matmul %6, %8, %cst_10 {dimension_numbers = #tpu.dot_dimension_numbers<[1], [0], [0], [1], [0, 0, 1, 1], [], []>} : vector<4x4xbf16>, vector<4x288xbf16>, vector<4x288xf32> -> vector<4x288xf32>
    %10 = arith.addf %4, %9 : vector<4x288xf32>
    %c2 = arith.constant 2 : index
    %c0_11 = arith.constant 0 : index
    %c0_12 = arith.constant 0 : index
    %11 = vector.load %arg2[%c2, %c0_11, %c0_12] : memref<9x4x4xbf16, #tpu.memory_space<vmem>>, vector<1x4x4xbf16>
    %12 = vector.shape_cast %11 : vector<1x4x4xbf16> to vector<4x4xbf16>
    %c0_13 = arith.constant 0 : index
    %c0_14 = arith.constant 0 : index
    %c2_15 = arith.constant 2 : index
    %13 = vector.load %arg1[%c0_13, %c0_14, %c2_15] : memref<1x4x326xbf16, #tpu.memory_space<vmem>>, vector<1x4x288xbf16>
    %14 = vector.shape_cast %13 : vector<1x4x288xbf16> to vector<4x288xbf16>
    %cst_16 = arith.constant dense<0.000000e+00> : vector<4x288xf32>
    %15 = tpu.matmul %12, %14, %cst_16 {dimension_numbers = #tpu.dot_dimension_numbers<[1], [0], [0], [1], [0, 0, 1, 1], [], []>} : vector<4x4xbf16>, vector<4x288xbf16>, vector<4x288xf32> -> vector<4x288xf32>
    %16 = arith.addf %10, %15 : vector<4x288xf32>
    %c3 = arith.constant 3 : index
    %c0_17 = arith.constant 0 : index
    %c0_18 = arith.constant 0 : index
    %17 = vector.load %arg2[%c3, %c0_17, %c0_18] : memref<9x4x4xbf16, #tpu.memory_space<vmem>>, vector<1x4x4xbf16>
    %18 = vector.shape_cast %17 : vector<1x4x4xbf16> to vector<4x4xbf16>
    %c0_19 = arith.constant 0 : index
    %c0_20 = arith.constant 0 : index
    %c18 = arith.constant 18 : index
    %19 = vector.load %arg1[%c0_19, %c0_20, %c18] : memref<1x4x326xbf16, #tpu.memory_space<vmem>>, vector<1x4x288xbf16>
    %20 = vector.shape_cast %19 : vector<1x4x288xbf16> to vector<4x288xbf16>
    %cst_21 = arith.constant dense<0.000000e+00> : vector<4x288xf32>
    %21 = tpu.matmul %18, %20, %cst_21 {dimension_numbers = #tpu.dot_dimension_numbers<[1], [0], [0], [1], [0, 0, 1, 1], [], []>} : vector<4x4xbf16>, vector<4x288xbf16>, vector<4x288xf32> -> vector<4x288xf32>
    %22 = arith.addf %16, %21 : vector<4x288xf32>
    %c4 = arith.constant 4 : index
    %c0_22 = arith.constant 0 : index
    %c0_23 = arith.constant 0 : index
    %23 = vector.load %arg2[%c4, %c0_22, %c0_23] : memref<9x4x4xbf16, #tpu.memory_space<vmem>>, vector<1x4x4xbf16>
    %24 = vector.shape_cast %23 : vector<1x4x4xbf16> to vector<4x4xbf16>
    %c0_24 = arith.constant 0 : index
    %c0_25 = arith.constant 0 : index
    %c19 = arith.constant 19 : index
    %25 = vector.load %arg1[%c0_24, %c0_25, %c19] : memref<1x4x326xbf16, #tpu.memory_space<vmem>>, vector<1x4x288xbf16>
    %26 = vector.shape_cast %25 : vector<1x4x288xbf16> to vector<4x288xbf16>
    %cst_26 = arith.constant dense<0.000000e+00> : vector<4x288xf32>
    %27 = tpu.matmul %24, %26, %cst_26 {dimension_numbers = #tpu.dot_dimension_numbers<[1], [0], [0], [1], [0, 0, 1, 1], [], []>} : vector<4x4xbf16>, vector<4x288xbf16>, vector<4x288xf32> -> vector<4x288xf32>
    %28 = arith.addf %22, %27 : vector<4x288xf32>
    %c5 = arith.constant 5 : index
    %c0_27 = arith.constant 0 : index
    %c0_28 = arith.constant 0 : index
    %29 = vector.load %arg2[%c5, %c0_27, %c0_28] : memref<9x4x4xbf16, #tpu.memory_space<vmem>>, vector<1x4x4xbf16>
    %30 = vector.shape_cast %29 : vector<1x4x4xbf16> to vector<4x4xbf16>
    %c0_29 = arith.constant 0 : index
    %c0_30 = arith.constant 0 : index
    %c20 = arith.constant 20 : index
    %31 = vector.load %arg1[%c0_29, %c0_30, %c20] : memref<1x4x326xbf16, #tpu.memory_space<vmem>>, vector<1x4x288xbf16>
    %32 = vector.shape_cast %31 : vector<1x4x288xbf16> to vector<4x288xbf16>
    %cst_31 = arith.constant dense<0.000000e+00> : vector<4x288xf32>
    %33 = tpu.matmul %30, %32, %cst_31 {dimension_numbers = #tpu.dot_dimension_numbers<[1], [0], [0], [1], [0, 0, 1, 1], [], []>} : vector<4x4xbf16>, vector<4x288xbf16>, vector<4x288xf32> -> vector<4x288xf32>
    %34 = arith.addf %28, %33 : vector<4x288xf32>
    %c6 = arith.constant 6 : index
    %c0_32 = arith.constant 0 : index
    %c0_33 = arith.constant 0 : index
    %35 = vector.load %arg2[%c6, %c0_32, %c0_33] : memref<9x4x4xbf16, #tpu.memory_space<vmem>>, vector<1x4x4xbf16>
    %36 = vector.shape_cast %35 : vector<1x4x4xbf16> to vector<4x4xbf16>
    %c0_34 = arith.constant 0 : index
    %c0_35 = arith.constant 0 : index
    %c36 = arith.constant 36 : index
    %37 = vector.load %arg1[%c0_34, %c0_35, %c36] : memref<1x4x326xbf16, #tpu.memory_space<vmem>>, vector<1x4x288xbf16>
    %38 = vector.shape_cast %37 : vector<1x4x288xbf16> to vector<4x288xbf16>
    %cst_36 = arith.constant dense<0.000000e+00> : vector<4x288xf32>
    %39 = tpu.matmul %36, %38, %cst_36 {dimension_numbers = #tpu.dot_dimension_numbers<[1], [0], [0], [1], [0, 0, 1, 1], [], []>} : vector<4x4xbf16>, vector<4x288xbf16>, vector<4x288xf32> -> vector<4x288xf32>
    %40 = arith.addf %34, %39 : vector<4x288xf32>
    %c7 = arith.constant 7 : index
    %c0_37 = arith.constant 0 : index
    %c0_38 = arith.constant 0 : index
    %41 = vector.load %arg2[%c7, %c0_37, %c0_38] : memref<9x4x4xbf16, #tpu.memory_space<vmem>>, vector<1x4x4xbf16>
    %42 = vector.shape_cast %41 : vector<1x4x4xbf16> to vector<4x4xbf16>
    %c0_39 = arith.constant 0 : index
    %c0_40 = arith.constant 0 : index
    %c37 = arith.constant 37 : index
    %43 = vector.load %arg1[%c0_39, %c0_40, %c37] : memref<1x4x326xbf16, #tpu.memory_space<vmem>>, vector<1x4x288xbf16>
    %44 = vector.shape_cast %43 : vector<1x4x288xbf16> to vector<4x288xbf16>
    %cst_41 = arith.constant dense<0.000000e+00> : vector<4x288xf32>
    %45 = tpu.matmul %42, %44, %cst_41 {dimension_numbers = #tpu.dot_dimension_numbers<[1], [0], [0], [1], [0, 0, 1, 1], [], []>} : vector<4x4xbf16>, vector<4x288xbf16>, vector<4x288xf32> -> vector<4x288xf32>
    %46 = arith.addf %40, %45 : vector<4x288xf32>
    %c8 = arith.constant 8 : index
    %c0_42 = arith.constant 0 : index
    %c0_43 = arith.constant 0 : index
    %47 = vector.load %arg2[%c8, %c0_42, %c0_43] : memref<9x4x4xbf16, #tpu.memory_space<vmem>>, vector<1x4x4xbf16>
    %48 = vector.shape_cast %47 : vector<1x4x4xbf16> to vector<4x4xbf16>
    %c0_44 = arith.constant 0 : index
    %c0_45 = arith.constant 0 : index
    %c38 = arith.constant 38 : index
    %49 = vector.load %arg1[%c0_44, %c0_45, %c38] : memref<1x4x326xbf16, #tpu.memory_space<vmem>>, vector<1x4x288xbf16>
    %50 = vector.shape_cast %49 : vector<1x4x288xbf16> to vector<4x288xbf16>
    %cst_46 = arith.constant dense<0.000000e+00> : vector<4x288xf32>
    %51 = tpu.matmul %48, %50, %cst_46 {dimension_numbers = #tpu.dot_dimension_numbers<[1], [0], [0], [1], [0, 0, 1, 1], [], []>} : vector<4x4xbf16>, vector<4x288xbf16>, vector<4x288xf32> -> vector<4x288xf32>
    %52 = arith.addf %46, %51 : vector<4x288xf32>
    %c0_47 = arith.constant 0 : index
    %c0_48 = arith.constant 0 : index
    %53 = vector.load %arg3[%c0_47, %c0_48] : memref<4x1xf32, #tpu.memory_space<vmem>>, vector<4x1xf32>
    %54 = vector.broadcast %53 : vector<4x1xf32> to vector<4x288xf32>
    %55 = arith.addf %52, %54 : vector<4x288xf32>
    %cst_49 = arith.constant 0.000000e+00 : f32
    %56 = vector.broadcast %cst_49 : f32 to vector<4x288xf32>
    %57 = arith.subf %56, %55 : vector<4x288xf32>
    %58 = math.exp %57 : vector<4x288xf32>
    %cst_50 = arith.constant 1.000000e+00 : f32
    %59 = vector.broadcast %cst_50 : f32 to vector<4x288xf32>
    %60 = arith.addf %59, %58 : vector<4x288xf32>
    %61 = tpu.reciprocal %60 {approx = true} : vector<4x288xf32> -> vector<4x288xf32>
    %62 = arith.mulf %55, %61 : vector<4x288xf32>
    %63 = arith.truncf %62 : vector<4x288xf32> to vector<4x288xbf16>
    %c0_51 = arith.constant 0 : index
    %c0_52 = arith.constant 0 : index
    %c0_53 = arith.constant 0 : index
    %64 = vector.load %arg4[%c0_51, %c0_52, %c0_53] : memref<1x4x288xbf16, #tpu.memory_space<vmem>>, vector<1x4x288xbf16>
    %65 = vector.shape_cast %64 : vector<1x4x288xbf16> to vector<4x288xbf16>
    %66 = vector.shape_cast %63 : vector<4x288xbf16> to vector<1x4x288xbf16>
    tpu.vector_store %arg4[%c0_51, %c0_52, %c0_53], %66 {strides = array<i32>} : memref<1x4x288xbf16, #tpu.memory_space<vmem>>, vector<1x4x288xbf16>,
    return
  }
  func.func @transform_0(%arg0: i32) -> (i32, i32, i32) {
    %c0_i32 = arith.constant 0 : i32
    %c0_i32_0 = arith.constant 0 : i32
    %c0_i32_1 = arith.constant 0 : i32
    return %arg0, %c0_i32, %c0_i32_0 : i32, i32, i32
  }
  func.func @transform_1(%arg0: i32) -> (i32, i32, i32) {
    %c0_i32 = arith.constant 0 : i32
    %c0_i32_0 = arith.constant 0 : i32
    %c0_i32_1 = arith.constant 0 : i32
    %c0_i32_2 = arith.constant 0 : i32
    return %c0_i32, %c0_i32_0, %c0_i32_1 : i32, i32, i32
  }
  func.func @transform_2(%arg0: i32) -> (i32, i32) {
    %c0_i32 = arith.constant 0 : i32
    %c0_i32_0 = arith.constant 0 : i32
    %c0_i32_1 = arith.constant 0 : i32
    return %c0_i32, %c0_i32_0 : i32, i32
  }
  func.func @transform_3(%arg0: i32) -> (i32, i32, i32) {
    %c0_i32 = arith.constant 0 : i32
    %c0_i32_0 = arith.constant 0 : i32
    %c0_i32_1 = arith.constant 0 : i32
    return %arg0, %c0_i32, %c0_i32_0 : i32, i32, i32
  }
}

module attributes {stable_mosaic.version = 11 : i64} {
  func.func @_spp_pool_kernel(%arg0: i32, %arg1: memref<1x4x796xbf16, #tpu.memory_space<vmem>>, %arg2: memref<1x12x448xbf16, #tpu.memory_space<vmem>>) attributes {dimension_semantics = [#tpu.dimension_semantics<parallel>], iteration_bounds = array<i64: 2>, scalar_prefetch = 0 : i64, scratch_operands = 0 : i64, tpu.core_type = #tpu.core_type<tc>, window_params = [{transform_indices = @transform_0, window_bounds = array<i64: 1, 4, 796>}, {transform_indices = @transform_1, window_bounds = array<i64: 1, 12, 448>}]} {
    %c0 = arith.constant 0 : index
    %c0_0 = arith.constant 0 : index
    %c0_1 = arith.constant 0 : index
    %0 = vector.load %arg1[%c0, %c0_0, %c0_1] : memref<1x4x796xbf16, #tpu.memory_space<vmem>>, vector<1x4x796xbf16>
    %1 = vector.shape_cast %0 : vector<1x4x796xbf16> to vector<4x796xbf16>
    %2 = vector.extract_strided_slice %1 {offsets = [0, 0], sizes = [4, 792], strides = [1, 1]} : vector<4x796xbf16> to vector<4x792xbf16>
    %3 = vector.extract_strided_slice %1 {offsets = [0, 1], sizes = [4, 792], strides = [1, 1]} : vector<4x796xbf16> to vector<4x792xbf16>
    %4 = arith.maximumf %2, %3 : vector<4x792xbf16>
    %5 = vector.extract_strided_slice %1 {offsets = [0, 2], sizes = [4, 792], strides = [1, 1]} : vector<4x796xbf16> to vector<4x792xbf16>
    %6 = arith.maximumf %4, %5 : vector<4x792xbf16>
    %7 = vector.extract_strided_slice %1 {offsets = [0, 3], sizes = [4, 792], strides = [1, 1]} : vector<4x796xbf16> to vector<4x792xbf16>
    %8 = arith.maximumf %6, %7 : vector<4x792xbf16>
    %9 = vector.extract_strided_slice %1 {offsets = [0, 4], sizes = [4, 792], strides = [1, 1]} : vector<4x796xbf16> to vector<4x792xbf16>
    %10 = arith.maximumf %8, %9 : vector<4x792xbf16>
    %11 = vector.extract_strided_slice %10 {offsets = [0, 0], sizes = [4, 680], strides = [1, 1]} : vector<4x792xbf16> to vector<4x680xbf16>
    %12 = vector.extract_strided_slice %10 {offsets = [0, 28], sizes = [4, 680], strides = [1, 1]} : vector<4x792xbf16> to vector<4x680xbf16>
    %13 = arith.maximumf %11, %12 : vector<4x680xbf16>
    %14 = vector.extract_strided_slice %10 {offsets = [0, 56], sizes = [4, 680], strides = [1, 1]} : vector<4x792xbf16> to vector<4x680xbf16>
    %15 = arith.maximumf %13, %14 : vector<4x680xbf16>
    %16 = vector.extract_strided_slice %10 {offsets = [0, 84], sizes = [4, 680], strides = [1, 1]} : vector<4x792xbf16> to vector<4x680xbf16>
    %17 = arith.maximumf %15, %16 : vector<4x680xbf16>
    %18 = vector.extract_strided_slice %10 {offsets = [0, 112], sizes = [4, 680], strides = [1, 1]} : vector<4x792xbf16> to vector<4x680xbf16>
    %19 = arith.maximumf %17, %18 : vector<4x680xbf16>
    %20 = vector.extract_strided_slice %19 {offsets = [0, 0], sizes = [4, 676], strides = [1, 1]} : vector<4x680xbf16> to vector<4x676xbf16>
    %21 = vector.extract_strided_slice %19 {offsets = [0, 1], sizes = [4, 676], strides = [1, 1]} : vector<4x680xbf16> to vector<4x676xbf16>
    %22 = arith.maximumf %20, %21 : vector<4x676xbf16>
    %23 = vector.extract_strided_slice %19 {offsets = [0, 2], sizes = [4, 676], strides = [1, 1]} : vector<4x680xbf16> to vector<4x676xbf16>
    %24 = arith.maximumf %22, %23 : vector<4x676xbf16>
    %25 = vector.extract_strided_slice %19 {offsets = [0, 3], sizes = [4, 676], strides = [1, 1]} : vector<4x680xbf16> to vector<4x676xbf16>
    %26 = arith.maximumf %24, %25 : vector<4x676xbf16>
    %27 = vector.extract_strided_slice %19 {offsets = [0, 4], sizes = [4, 676], strides = [1, 1]} : vector<4x680xbf16> to vector<4x676xbf16>
    %28 = arith.maximumf %26, %27 : vector<4x676xbf16>
    %29 = vector.extract_strided_slice %28 {offsets = [0, 0], sizes = [4, 564], strides = [1, 1]} : vector<4x676xbf16> to vector<4x564xbf16>
    %30 = vector.extract_strided_slice %28 {offsets = [0, 28], sizes = [4, 564], strides = [1, 1]} : vector<4x676xbf16> to vector<4x564xbf16>
    %31 = arith.maximumf %29, %30 : vector<4x564xbf16>
    %32 = vector.extract_strided_slice %28 {offsets = [0, 56], sizes = [4, 564], strides = [1, 1]} : vector<4x676xbf16> to vector<4x564xbf16>
    %33 = arith.maximumf %31, %32 : vector<4x564xbf16>
    %34 = vector.extract_strided_slice %28 {offsets = [0, 84], sizes = [4, 564], strides = [1, 1]} : vector<4x676xbf16> to vector<4x564xbf16>
    %35 = arith.maximumf %33, %34 : vector<4x564xbf16>
    %36 = vector.extract_strided_slice %28 {offsets = [0, 112], sizes = [4, 564], strides = [1, 1]} : vector<4x676xbf16> to vector<4x564xbf16>
    %37 = arith.maximumf %35, %36 : vector<4x564xbf16>
    %38 = vector.extract_strided_slice %37 {offsets = [0, 0], sizes = [4, 560], strides = [1, 1]} : vector<4x564xbf16> to vector<4x560xbf16>
    %39 = vector.extract_strided_slice %37 {offsets = [0, 1], sizes = [4, 560], strides = [1, 1]} : vector<4x564xbf16> to vector<4x560xbf16>
    %40 = arith.maximumf %38, %39 : vector<4x560xbf16>
    %41 = vector.extract_strided_slice %37 {offsets = [0, 2], sizes = [4, 560], strides = [1, 1]} : vector<4x564xbf16> to vector<4x560xbf16>
    %42 = arith.maximumf %40, %41 : vector<4x560xbf16>
    %43 = vector.extract_strided_slice %37 {offsets = [0, 3], sizes = [4, 560], strides = [1, 1]} : vector<4x564xbf16> to vector<4x560xbf16>
    %44 = arith.maximumf %42, %43 : vector<4x560xbf16>
    %45 = vector.extract_strided_slice %37 {offsets = [0, 4], sizes = [4, 560], strides = [1, 1]} : vector<4x564xbf16> to vector<4x560xbf16>
    %46 = arith.maximumf %44, %45 : vector<4x560xbf16>
    %47 = vector.extract_strided_slice %46 {offsets = [0, 0], sizes = [4, 448], strides = [1, 1]} : vector<4x560xbf16> to vector<4x448xbf16>
    %48 = vector.extract_strided_slice %46 {offsets = [0, 28], sizes = [4, 448], strides = [1, 1]} : vector<4x560xbf16> to vector<4x448xbf16>
    %49 = arith.maximumf %47, %48 : vector<4x448xbf16>
    %50 = vector.extract_strided_slice %46 {offsets = [0, 56], sizes = [4, 448], strides = [1, 1]} : vector<4x560xbf16> to vector<4x448xbf16>
    %51 = arith.maximumf %49, %50 : vector<4x448xbf16>
    %52 = vector.extract_strided_slice %46 {offsets = [0, 84], sizes = [4, 448], strides = [1, 1]} : vector<4x560xbf16> to vector<4x448xbf16>
    %53 = arith.maximumf %51, %52 : vector<4x448xbf16>
    %54 = vector.extract_strided_slice %46 {offsets = [0, 112], sizes = [4, 448], strides = [1, 1]} : vector<4x560xbf16> to vector<4x448xbf16>
    %55 = arith.maximumf %53, %54 : vector<4x448xbf16>
    %56 = vector.extract_strided_slice %19 {offsets = [0, 116], sizes = [4, 448], strides = [1, 1]} : vector<4x680xbf16> to vector<4x448xbf16>
    %c0_2 = arith.constant 0 : index
    %c0_3 = arith.constant 0 : index
    %c0_4 = arith.constant 0 : index
    %57 = vector.load %arg2[%c0_2, %c0_3, %c0_4] : memref<1x12x448xbf16, #tpu.memory_space<vmem>>, vector<1x4x448xbf16>
    %58 = vector.shape_cast %57 : vector<1x4x448xbf16> to vector<4x448xbf16>
    %59 = vector.shape_cast %56 : vector<4x448xbf16> to vector<1x4x448xbf16>
    tpu.vector_store %arg2[%c0_2, %c0_3, %c0_4], %59 {strides = array<i32>} : memref<1x12x448xbf16, #tpu.memory_space<vmem>>, vector<1x4x448xbf16>,
    %60 = vector.extract_strided_slice %37 {offsets = [0, 58], sizes = [4, 448], strides = [1, 1]} : vector<4x564xbf16> to vector<4x448xbf16>
    %c0_5 = arith.constant 0 : index
    %c4 = arith.constant 4 : index
    %c0_6 = arith.constant 0 : index
    %61 = vector.load %arg2[%c0_5, %c4, %c0_6] : memref<1x12x448xbf16, #tpu.memory_space<vmem>>, vector<1x4x448xbf16>
    %62 = vector.shape_cast %61 : vector<1x4x448xbf16> to vector<4x448xbf16>
    %63 = vector.shape_cast %60 : vector<4x448xbf16> to vector<1x4x448xbf16>
    tpu.vector_store %arg2[%c0_5, %c4, %c0_6], %63 {strides = array<i32>} : memref<1x12x448xbf16, #tpu.memory_space<vmem>>, vector<1x4x448xbf16>,
    %c0_7 = arith.constant 0 : index
    %c8 = arith.constant 8 : index
    %c0_8 = arith.constant 0 : index
    %64 = vector.load %arg2[%c0_7, %c8, %c0_8] : memref<1x12x448xbf16, #tpu.memory_space<vmem>>, vector<1x4x448xbf16>
    %65 = vector.shape_cast %64 : vector<1x4x448xbf16> to vector<4x448xbf16>
    %66 = vector.shape_cast %55 : vector<4x448xbf16> to vector<1x4x448xbf16>
    tpu.vector_store %arg2[%c0_7, %c8, %c0_8], %66 {strides = array<i32>} : memref<1x12x448xbf16, #tpu.memory_space<vmem>>, vector<1x4x448xbf16>,
    return
  }
  func.func @transform_0(%arg0: i32) -> (i32, i32, i32) {
    %c0_i32 = arith.constant 0 : i32
    %c0_i32_0 = arith.constant 0 : i32
    %c0_i32_1 = arith.constant 0 : i32
    return %arg0, %c0_i32, %c0_i32_0 : i32, i32, i32
  }
  func.func @transform_1(%arg0: i32) -> (i32, i32, i32) {
    %c0_i32 = arith.constant 0 : i32
    %c0_i32_0 = arith.constant 0 : i32
    %c0_i32_1 = arith.constant 0 : i32
    return %arg0, %c0_i32, %c0_i32_0 : i32, i32, i32
  }
}

module attributes {stable_mosaic.version = 11 : i64} {
  func.func @kernel(%arg0: i32, %arg1: i32, %arg2: memref<1x4x256xbf16, #tpu.memory_space<vmem>>, %arg3: memref<1x12x256xbf16, #tpu.memory_space<vmem>>, %arg4: memref<4x4xbf16, #tpu.memory_space<vmem>>, %arg5: memref<4x12xbf16, #tpu.memory_space<vmem>>, %arg6: memref<4x1xf32, #tpu.memory_space<vmem>>, %arg7: memref<1x4x256xbf16, #tpu.memory_space<vmem>>) attributes {dimension_semantics = [#tpu.dimension_semantics<parallel>, #tpu.dimension_semantics<parallel>], iteration_bounds = array<i64: 2, 1>, scalar_prefetch = 0 : i64, scratch_operands = 0 : i64, tpu.core_type = #tpu.core_type<tc>, window_params = [{transform_indices = @transform_0, window_bounds = array<i64: 1, 4, 256>}, {transform_indices = @transform_1, window_bounds = array<i64: 1, 12, 256>}, {pipeline_mode = #tpu.pipeline_mode<synchronous>, transform_indices = @transform_2, window_bounds = array<i64: 4, 4>}, {pipeline_mode = #tpu.pipeline_mode<synchronous>, transform_indices = @transform_3, window_bounds = array<i64: 4, 12>}, {pipeline_mode = #tpu.pipeline_mode<synchronous>, transform_indices = @transform_4, window_bounds = array<i64: 4, 1>}, {transform_indices = @transform_5, window_bounds = array<i64: 1, 4, 256>}]} {
    %c0 = arith.constant 0 : index
    %c0_0 = arith.constant 0 : index
    %0 = vector.load %arg4[%c0, %c0_0] : memref<4x4xbf16, #tpu.memory_space<vmem>>, vector<4x4xbf16>
    %c0_1 = arith.constant 0 : index
    %c0_2 = arith.constant 0 : index
    %c0_3 = arith.constant 0 : index
    %1 = vector.load %arg2[%c0_1, %c0_2, %c0_3] : memref<1x4x256xbf16, #tpu.memory_space<vmem>>, vector<1x4x256xbf16>
    %2 = vector.shape_cast %1 : vector<1x4x256xbf16> to vector<4x256xbf16>
    %cst = arith.constant dense<0.000000e+00> : vector<4x256xf32>
    %3 = tpu.matmul %0, %2, %cst {dimension_numbers = #tpu.dot_dimension_numbers<[1], [0], [0], [1], [0, 0, 1, 1], [], []>} : vector<4x4xbf16>, vector<4x256xbf16>, vector<4x256xf32> -> vector<4x256xf32>
    %c0_4 = arith.constant 0 : index
    %c0_5 = arith.constant 0 : index
    %4 = vector.load %arg5[%c0_4, %c0_5] : memref<4x12xbf16, #tpu.memory_space<vmem>>, vector<4x12xbf16>
    %c0_6 = arith.constant 0 : index
    %c0_7 = arith.constant 0 : index
    %c0_8 = arith.constant 0 : index
    %5 = vector.load %arg3[%c0_6, %c0_7, %c0_8] : memref<1x12x256xbf16, #tpu.memory_space<vmem>>, vector<1x12x256xbf16>
    %6 = vector.shape_cast %5 : vector<1x12x256xbf16> to vector<12x256xbf16>
    %cst_9 = arith.constant dense<0.000000e+00> : vector<4x256xf32>
    %7 = tpu.matmul %4, %6, %cst_9 {dimension_numbers = #tpu.dot_dimension_numbers<[1], [0], [0], [1], [0, 0, 1, 1], [], []>} : vector<4x12xbf16>, vector<12x256xbf16>, vector<4x256xf32> -> vector<4x256xf32>
    %8 = arith.addf %3, %7 : vector<4x256xf32>
    %c0_10 = arith.constant 0 : index
    %c0_11 = arith.constant 0 : index
    %9 = vector.load %arg6[%c0_10, %c0_11] : memref<4x1xf32, #tpu.memory_space<vmem>>, vector<4x1xf32>
    %10 = vector.broadcast %9 : vector<4x1xf32> to vector<4x256xf32>
    %11 = arith.addf %8, %10 : vector<4x256xf32>
    %cst_12 = arith.constant 0.000000e+00 : f32
    %12 = vector.broadcast %cst_12 : f32 to vector<4x256xf32>
    %13 = arith.subf %12, %11 : vector<4x256xf32>
    %14 = math.exp %13 : vector<4x256xf32>
    %cst_13 = arith.constant 1.000000e+00 : f32
    %15 = vector.broadcast %cst_13 : f32 to vector<4x256xf32>
    %16 = arith.addf %15, %14 : vector<4x256xf32>
    %17 = tpu.reciprocal %16 {approx = true} : vector<4x256xf32> -> vector<4x256xf32>
    %18 = arith.mulf %11, %17 : vector<4x256xf32>
    %19 = arith.truncf %18 : vector<4x256xf32> to vector<4x256xbf16>
    %c0_14 = arith.constant 0 : index
    %c0_15 = arith.constant 0 : index
    %c0_16 = arith.constant 0 : index
    %20 = vector.load %arg7[%c0_14, %c0_15, %c0_16] : memref<1x4x256xbf16, #tpu.memory_space<vmem>>, vector<1x4x256xbf16>
    %21 = vector.shape_cast %20 : vector<1x4x256xbf16> to vector<4x256xbf16>
    %22 = vector.shape_cast %19 : vector<4x256xbf16> to vector<1x4x256xbf16>
    tpu.vector_store %arg7[%c0_14, %c0_15, %c0_16], %22 {strides = array<i32>} : memref<1x4x256xbf16, #tpu.memory_space<vmem>>, vector<1x4x256xbf16>,
    return
  }
  func.func @transform_0(%arg0: i32, %arg1: i32) -> (i32, i32, i32) {
    %c0_i32 = arith.constant 0 : i32
    %c0_i32_0 = arith.constant 0 : i32
    return %arg0, %c0_i32, %arg1 : i32, i32, i32
  }
  func.func @transform_1(%arg0: i32, %arg1: i32) -> (i32, i32, i32) {
    %c0_i32 = arith.constant 0 : i32
    %c0_i32_0 = arith.constant 0 : i32
    return %arg0, %c0_i32, %arg1 : i32, i32, i32
  }
  func.func @transform_2(%arg0: i32, %arg1: i32) -> (i32, i32) {
    %c0_i32 = arith.constant 0 : i32
    %c0_i32_0 = arith.constant 0 : i32
    %c0_i32_1 = arith.constant 0 : i32
    return %c0_i32, %c0_i32_0 : i32, i32
  }
  func.func @transform_3(%arg0: i32, %arg1: i32) -> (i32, i32) {
    %c0_i32 = arith.constant 0 : i32
    %c0_i32_0 = arith.constant 0 : i32
    %c0_i32_1 = arith.constant 0 : i32
    return %c0_i32, %c0_i32_0 : i32, i32
  }
  func.func @transform_4(%arg0: i32, %arg1: i32) -> (i32, i32) {
    %c0_i32 = arith.constant 0 : i32
    %c0_i32_0 = arith.constant 0 : i32
    %c0_i32_1 = arith.constant 0 : i32
    return %c0_i32, %c0_i32_0 : i32, i32
  }
  func.func @transform_5(%arg0: i32, %arg1: i32) -> (i32, i32, i32) {
    %c0_i32 = arith.constant 0 : i32
    %c0_i32_0 = arith.constant 0 : i32
    return %arg0, %c0_i32, %arg1 : i32, i32, i32
  }
}

module attributes {stable_mosaic.version = 11 : i64} {
  func.func @kernel(%arg0: i32, %arg1: i32, %arg2: memref<1x4x256xbf16, #tpu.memory_space<vmem>>, %arg3: memref<1x4x256xbf16, #tpu.memory_space<vmem>>, %arg4: memref<4x4xbf16, #tpu.memory_space<vmem>>, %arg5: memref<4x4xbf16, #tpu.memory_space<vmem>>, %arg6: memref<4x1xf32, #tpu.memory_space<vmem>>, %arg7: memref<1x4x256xf32, #tpu.memory_space<vmem>>) attributes {dimension_semantics = [#tpu.dimension_semantics<parallel>, #tpu.dimension_semantics<parallel>], iteration_bounds = array<i64: 2, 1>, scalar_prefetch = 0 : i64, scratch_operands = 0 : i64, tpu.core_type = #tpu.core_type<tc>, window_params = [{transform_indices = @transform_0, window_bounds = array<i64: 1, 4, 256>}, {transform_indices = @transform_1, window_bounds = array<i64: 1, 4, 256>}, {pipeline_mode = #tpu.pipeline_mode<synchronous>, transform_indices = @transform_2, window_bounds = array<i64: 4, 4>}, {pipeline_mode = #tpu.pipeline_mode<synchronous>, transform_indices = @transform_3, window_bounds = array<i64: 4, 4>}, {pipeline_mode = #tpu.pipeline_mode<synchronous>, transform_indices = @transform_4, window_bounds = array<i64: 4, 1>}, {transform_indices = @transform_5, window_bounds = array<i64: 1, 4, 256>}]} {
    %c0 = arith.constant 0 : index
    %c0_0 = arith.constant 0 : index
    %0 = vector.load %arg4[%c0, %c0_0] : memref<4x4xbf16, #tpu.memory_space<vmem>>, vector<4x4xbf16>
    %c0_1 = arith.constant 0 : index
    %c0_2 = arith.constant 0 : index
    %c0_3 = arith.constant 0 : index
    %1 = vector.load %arg2[%c0_1, %c0_2, %c0_3] : memref<1x4x256xbf16, #tpu.memory_space<vmem>>, vector<1x4x256xbf16>
    %2 = vector.shape_cast %1 : vector<1x4x256xbf16> to vector<4x256xbf16>
    %cst = arith.constant dense<0.000000e+00> : vector<4x256xf32>
    %3 = tpu.matmul %0, %2, %cst {dimension_numbers = #tpu.dot_dimension_numbers<[1], [0], [0], [1], [0, 0, 1, 1], [], []>} : vector<4x4xbf16>, vector<4x256xbf16>, vector<4x256xf32> -> vector<4x256xf32>
    %c0_4 = arith.constant 0 : index
    %c0_5 = arith.constant 0 : index
    %4 = vector.load %arg5[%c0_4, %c0_5] : memref<4x4xbf16, #tpu.memory_space<vmem>>, vector<4x4xbf16>
    %c0_6 = arith.constant 0 : index
    %c0_7 = arith.constant 0 : index
    %c0_8 = arith.constant 0 : index
    %5 = vector.load %arg3[%c0_6, %c0_7, %c0_8] : memref<1x4x256xbf16, #tpu.memory_space<vmem>>, vector<1x4x256xbf16>
    %6 = vector.shape_cast %5 : vector<1x4x256xbf16> to vector<4x256xbf16>
    %cst_9 = arith.constant dense<0.000000e+00> : vector<4x256xf32>
    %7 = tpu.matmul %4, %6, %cst_9 {dimension_numbers = #tpu.dot_dimension_numbers<[1], [0], [0], [1], [0, 0, 1, 1], [], []>} : vector<4x4xbf16>, vector<4x256xbf16>, vector<4x256xf32> -> vector<4x256xf32>
    %8 = arith.addf %3, %7 : vector<4x256xf32>
    %c0_10 = arith.constant 0 : index
    %c0_11 = arith.constant 0 : index
    %9 = vector.load %arg6[%c0_10, %c0_11] : memref<4x1xf32, #tpu.memory_space<vmem>>, vector<4x1xf32>
    %10 = vector.broadcast %9 : vector<4x1xf32> to vector<4x256xf32>
    %11 = arith.addf %8, %10 : vector<4x256xf32>
    %cst_12 = arith.constant 0.000000e+00 : f32
    %12 = vector.broadcast %cst_12 : f32 to vector<4x256xf32>
    %13 = arith.subf %12, %11 : vector<4x256xf32>
    %14 = math.exp %13 : vector<4x256xf32>
    %cst_13 = arith.constant 1.000000e+00 : f32
    %15 = vector.broadcast %cst_13 : f32 to vector<4x256xf32>
    %16 = arith.addf %15, %14 : vector<4x256xf32>
    %17 = tpu.reciprocal %16 {approx = true} : vector<4x256xf32> -> vector<4x256xf32>
    %18 = arith.mulf %11, %17 : vector<4x256xf32>
    %c0_14 = arith.constant 0 : index
    %c0_15 = arith.constant 0 : index
    %c0_16 = arith.constant 0 : index
    %19 = vector.load %arg7[%c0_14, %c0_15, %c0_16] : memref<1x4x256xf32, #tpu.memory_space<vmem>>, vector<1x4x256xf32>
    %20 = vector.shape_cast %19 : vector<1x4x256xf32> to vector<4x256xf32>
    %21 = vector.shape_cast %18 : vector<4x256xf32> to vector<1x4x256xf32>
    tpu.vector_store %arg7[%c0_14, %c0_15, %c0_16], %21 {strides = array<i32>} : memref<1x4x256xf32, #tpu.memory_space<vmem>>, vector<1x4x256xf32>,
    return
  }
  func.func @transform_0(%arg0: i32, %arg1: i32) -> (i32, i32, i32) {
    %c0_i32 = arith.constant 0 : i32
    %c0_i32_0 = arith.constant 0 : i32
    return %arg0, %c0_i32, %arg1 : i32, i32, i32
  }
  func.func @transform_1(%arg0: i32, %arg1: i32) -> (i32, i32, i32) {
    %c0_i32 = arith.constant 0 : i32
    %c0_i32_0 = arith.constant 0 : i32
    return %arg0, %c0_i32, %arg1 : i32, i32, i32
  }
  func.func @transform_2(%arg0: i32, %arg1: i32) -> (i32, i32) {
    %c0_i32 = arith.constant 0 : i32
    %c0_i32_0 = arith.constant 0 : i32
    %c0_i32_1 = arith.constant 0 : i32
    return %c0_i32, %c0_i32_0 : i32, i32
  }
  func.func @transform_3(%arg0: i32, %arg1: i32) -> (i32, i32) {
    %c0_i32 = arith.constant 0 : i32
    %c0_i32_0 = arith.constant 0 : i32
    %c0_i32_1 = arith.constant 0 : i32
    return %c0_i32, %c0_i32_0 : i32, i32
  }
  func.func @transform_4(%arg0: i32, %arg1: i32) -> (i32, i32) {
    %c0_i32 = arith.constant 0 : i32
    %c0_i32_0 = arith.constant 0 : i32
    %c0_i32_1 = arith.constant 0 : i32
    return %c0_i32, %c0_i32_0 : i32, i32
  }
  func.func @transform_5(%arg0: i32, %arg1: i32) -> (i32, i32, i32) {
    %c0_i32 = arith.constant 0 : i32
    %c0_i32_0 = arith.constant 0 : i32
    return %arg0, %c0_i32, %arg1 : i32, i32, i32
  }
}

</mosaic_0001>

<bundles_post_ra>
// kernel: sppfcspc_forward.8
= control target key start
LH: loop header
LB: loop body
LE: loop exit
PB: predicated region body
PF: predicated region fallthrough
CT: control target
= control target key end

     0   :  { %s459_s12 = smov 0   ;;  %s461_s13 = smov 0   ;;  %s508_s0 = inlined_call_operand.vmem [shape: bf16[2,4,256], index: 0, kind: input, shape index: {}]   ;;  %s509_s1 = inlined_call_operand.vmem [shape: bf16[4,4], index: 1, kind: input, shape index: {}]   ;;  %s510_s2 = inlined_call_operand.vmem [shape: f32[4,1], index: 2, kind: input, shape index: {}]   ;;  %s511_s3 = inlined_call_operand.vmem [shape: bf16[2,4,256], index: 3, kind: output, shape index: {}]  }
   0x1   :  { %s463_s14 = smov 0  }
   0x2 LB: > { %s25_s15 = sadd.s32 1, %s432_s13  ;;  %p369_p0 = scmp.ge.s32.totalorder %s436_s14, 1  ;;  %s436_s14 = sphi %s463_s14, %s13_s14   ;;  %s432_s13 = sphi %s461_s13, %s513_s13   ;;  %s428_s12 = sphi %s459_s12, %s512_s12  }
   0x3   : > { %p27_p1 = scmp.ge.s32.totalorder %s25_s15, 2  ;;  %p158_p2 = scmp.lt.s32.totalorder %s436_s14, 3 }
   0x5   : > { %s515_s15 = smov (%p27_p1, %s25_s15), 0  ;;  %p159_p3 = pnand %p369_p0, %p158_p2 }
   0x6   : > { %p191_p4 = scmp.lt.s32.totalorder (!%p159_p3), %s428_s12, 1 }
   0x7   : > { %162 = sbr.rel (%p159_p3) target bundleno = 185 (0xb9), region = 32 }
   0xc   : > { %v438_v0 = vmov 0   ;;  %v213_v1 = vld [vmem:[%s510_s2] sm:$0xf]  ;;  %s517_s12 = smov (!%p191_p4, %s428_s12), 1  ;;  %vm227_vm0 = vcmask 1041408   ;;  %vm223_vm1 = vcmask 31744  }
   0xd   : > { %405 = vset.pattern.permute.xlu0 %v438_v0  ;;  %s378_s18 = sshll.u32 %s517_s12, 2  ;;  %v211_v7 = vld [vmem:[%s509_s1] sm:$0x3] }
   0xe   : > { %216 = vperm.xlu0 %405, %v213_v1   ;;  %s198_s21 = scalar_lea.vmem %s508_s0, %s378_s18  ;;  %s208_s26 = scalar_lea.vmem %s511_s3, %s378_s18 }
   0xf   : > { %v212_v2 = vld [vmem:[%s198_s21] sm:$0xf] }
  0x10   : > { %220 = vst [vmem:[#allocation1] ss:$4 sm:$0xff] %v212_v2 }
  0x17   : > { %v221_v3 = vld.sshfl [vmem:[#allocation1] sm:$0xff pattern:$0x73625140]  ;;  %v222_v4 = vld.sshfl [vmem:[#allocation1 + $0x8] sm:$0xff pattern:$0x73625140] }
  0x18   : > { %v228_v5 = vsel %vm227_vm0, %v221_v3, 0  ;;  %v230_v6 = vsel %vm227_vm0, %v222_v4, 0 }
  0x19   : > { %239 = vmatpush.bf16.msra.mxu0 %v228_v5  ;;  %252 = vmatpush.bf16.msra.mxu1 %v230_v6 }
  0x1c   : > { %374 = vmatmul.msk.bf16.vlgmr.msra.gmra.mxu0 %vm223_vm1, %v211_v7  ;;  %375 = vmatmul.msk.bf16.vlgmr.msra.gmra.mxu1 %vm223_vm1, %v211_v7 }
  0x80   : > { %v217_v8 = vpop.permute.xlu0 %216 }
  0x99   : > { %v241_v9 = vpop.f32.mrf.mxu0  ;;  %v254_v10 = vpop.f32.mrf.mxu1 }
  0x9a   : > { %v242_v11 = vadd.f32 %v241_v9, %v217_v8  ;;  %v255_v12 = vadd.f32 %v254_v10, %v217_v8 }
  0x9c   : > { %v258_v13 = vsub.f32 0.0, %v242_v11  ;;  %v259_v14 = vsub.f32 0.0, %v255_v12 }
  0x9e   : > { %v260_v15 = vmul.f32 1.442695, %v258_v13  ;;  %v262_v16 = vmul.f32 1.442695, %v259_v14 }
  0xa0   : > { %406 = vpow2.f32 %v260_v15 }
  0xa1   : > { %408 = vpow2.f32 %v262_v16  ;;  %v243_v17 = vpop.f32.mrf.mxu0  ;;  %v256_v18 = vpop.f32.mrf.mxu1 }
  0xa6   : > { %v407_v19 = vpop.eup %406 }
  0xa7   : > { %v409_v20 = vpop.eup %408  ;;  %v264_v21 = vadd.f32 1.0, %v407_v19 }
  0xa8   : > { %v265_v22 = vadd.f32 1.0, %v409_v20 }
  0xa9   : > { %410 = vrcp.f32 %v264_v21 }
  0xaa   : > { %412 = vrcp.f32 %v265_v22 }
  0xaf   : > { %v411_v23 = vpop.eup %410 }
  0xb0   : > { %v413_v24 = vpop.eup %412  ;;  %v268_v25 = vmul.f32 %v411_v23, %v242_v11 }
  0xb1   : > { %v269_v26 = vmul.f32 %v413_v24, %v255_v12 }
  0xb3   : > { %v270_v27 = vpack.c.bf16 %v269_v26, %v268_v25 }
  0xb5   : > { %v272_v28 = vrot.slane %v270_v27, 2 }
  0xb7   : > { %v275_v29 = vsel %vm227_vm0, %v270_v27, %v272_v28 }
  0xb8   : > { %277 = vst [vmem:[%s208_s26] sm:$0xf] %v275_v29 }
  0xb9 PF: > { %s13_s14 = sadd.s32 1, %s436_s14   ;;  %s512_s12 = smov %s432_s13 }
  0xba   : > { %p10_p5 = scmp.ge.s32.totalorder %s13_s14, 4   ;;  %s513_s13 = smov %s515_s15 }
  0xbc   :  { %12 = sbr.rel (!%p10_p5) target bundleno = 2 (0x2), region = 62 }

// kernel: sppfcspc_forward.9
= control target key start
LH: loop header
LB: loop body
LE: loop exit
PB: predicated region body
PF: predicated region fallthrough
CT: control target
= control target key end

     0   :  { %s1032_s12 = smov 0   ;;  %s1165_s0 = inlined_call_operand.vmem [shape: bf16[2,4,326], index: 0, kind: input, shape index: {}]   ;;  %s1166_s1 = inlined_call_operand.vmem [shape: bf16[9,4,4], index: 1, kind: input, shape index: {}]   ;;  %s1167_s2 = inlined_call_operand.vmem [shape: f32[4,1], index: 2, kind: input, shape index: {}]   ;;  %s1168_s3 = inlined_call_operand.vmem [shape: bf16[2,4,288], index: 3, kind: output, shape index: {}]  }
   0x1 LB: > { %s920_s13 = sadd.s32 4294967295, %s1001_s12   ;;  %p924_p0 = scmp.ge.s32.totalorder %s1001_s12, 1  ;;  %s1001_s12 = sphi %s1032_s12, %s13_s12  }
   0x2   : > { %p137_p1 = scmp.lt.s32.totalorder %s1001_s12, 3 }
   0x4   : > { %p138_p2 = pnand %p924_p0, %p137_p1 }
   0x5   : > { %p161_p3 = scmp.lt.s32.totalorder (!%p138_p2), %s920_s13, 1  ;;  %s1003_s18 = smov (!%p138_p2), 127  }
   0x6   : > { %141 = sbr.rel (%p138_p2) target bundleno = 408 (0x198), region = 32  ;;  %s1004_s19 = smov (!%p138_p2), 126  }
   0x7   : > { %s1005_s20 = smov (!%p138_p2), 110   ;;  %s1006_s21 = smov (!%p138_p2), 109  }
   0x8   : > { %s1007_s22 = smov (!%p138_p2), 108   ;;  %s1008_s23 = smov (!%p138_p2), 92  }
   0x9   : > { %s1009_s24 = smov (!%p138_p2), 91   ;;  %s1010_s25 = smov (!%p138_p2), 90  }
   0xb   : > { %s1170_s13 = smov (!%p161_p3, %s920_s13), 1  ;;  %vm197_vm0 = vcmask 1041408   ;;  %v172_v36 = vld [vmem:[%s1166_s1] sm:$0x3]  ;;  %vm193_vm1 = vcmask 31744   ;;  %vm190_vm2 = vcmask 1039360  }
   0xc   : > { %s964_s14 = smul.u32 6, %s1170_s13  ;;  %v927_v44 = vld [vmem:[%s1166_s1 + $0x2] sm:$0x3]  ;;  %vm315_vm3 = vcmask 1031168   ;;  %v934_v48 = vld [vmem:[%s1166_s1 + $0x4] sm:$0x3] }
   0xd   : > { %vm389_vm4 = vcmask 900096   ;;  %vm463_vm5 = vcmask 891904   ;;  %vm537_vm6 = vcmask 883712   ;;  %vm611_vm7 = vcmask 752640  }
   0xe   : > { %s1048_s17 = scalar_lea.vmem %s1165_s0, %s964_s14  ;;  %vm685_vm8 = vcmask 744448   ;;  %vm759_vm9 = vcmask 736256   ;;  %vm860_vm10 = vcmask 1043458   ;;  %vm862_vm12 = vcmask 259076  }
   0xf   : > { %v173_v0 = vld [vmem:[%s1048_s17] sm:$0x3f]  ;;  %vm861_vm11 = vmor %vm860_vm10, %vm197_vm0  ;;  %vm853_vm13 = vcmask 1045508   ;;  %vm857_vm14 = vcmask 1043456  }
  0x10   : > { %177 = vst [vmem:[#allocation1] ss:$4 sm:$0xff] %v173_v0  ;;  %v300_v4 = vld [vmem:[%s1048_s17] sm:$0x3f]  ;;  %vm863_vm15 = vmor %vm862_vm12, %vm861_vm11 }
  0x11   : > { %v374_v8 = vld [vmem:[%s1048_s17] sm:$0x3f] }
  0x12   : > { %v448_v12 = vld [vmem:[%s1048_s17] sm:$0x3f] }
  0x13   : > { %v522_v16 = vld [vmem:[%s1048_s17] sm:$0x3f] }
  0x14   : > { %v596_v20 = vld [vmem:[%s1048_s17] sm:$0x3f] }
  0x15   : > { %v670_v24 = vld [vmem:[%s1048_s17] sm:$0x3f] }
  0x16   : > { %v744_v28 = vld [vmem:[%s1048_s17] sm:$0x3f] }
  0x17   : > { %v182_v1 = vld.sshfl [vmem:[#allocation1 + $0x10] sm:$0xff pattern:$0x73625140]  ;;  %v180_v2 = vld.sshfl [vmem:[#allocation1 + $0x8] sm:$0xff pattern:$0x73625140] }
  0x18   : > { %188 = vrot.lane.b32.xlu0 %v182_v1, %s1003_s18  ;;  %186 = vrot.lane.b32.xlu1 %v180_v2, %s1003_s18  ;;  %v178_v3 = vld.sshfl [vmem:[#allocation1] sm:$0xff pattern:$0x73625140] }
  0x19   : > { %246 = vst [vmem:[#allocation1] ss:$4 sm:$0xff] %v173_v0  ;;  %v938_v1 = vld [vmem:[%s1166_s1 + $0x6] sm:$0x3] }
  0x20   : > { %184 = vrot.lane.b32.xlu0 %v178_v3, %s1003_s18  ;;  %v1052_v5 = vld.sshfl [vmem:[#allocation1] sm:$0xff pattern:$0x73625140]  ;;  %v1054_v6 = vld.sshfl [vmem:[#allocation1 + $0x8] sm:$0xff pattern:$0x73625140] }
  0x21   : > { %v1056_v7 = vld.sshfl [vmem:[#allocation1 + $0x10] sm:$0xff pattern:$0x73625140]  ;;  %v253_v35 = vsel %vm197_vm0, %v1052_v5, 0  ;;  %v255_v51 = vsel %vm197_vm0, %v1054_v6, 0 }
  0x22   : > { %302 = vst [vmem:[#allocation1] ss:$4 sm:$0xff] %v300_v4  ;;  %266 = vmatpush.bf16.msra.mxu3 %v253_v35  ;;  %v257_v42 = vsel %vm197_vm0, %v1056_v7, 0 }
  0x25   : > { %931 = vmatmul.msk.bf16.vlgmr.msra.gmra.mxu3 %vm193_vm1, %v172_v36 }
  0x29   : > { %v303_v9 = vld.sshfl [vmem:[#allocation1] sm:$0xff pattern:$0x73625140]  ;;  %v305_v10 = vld.sshfl [vmem:[#allocation1 + $0x8] sm:$0xff pattern:$0x73625140] }
  0x2a   : > { %309 = vrot.lane.b32.xlu1 %v303_v9, %s1004_s19  ;;  %311 = vrot.lane.b32.xlu2 %v305_v10, %s1004_s19  ;;  %v307_v11 = vld.sshfl [vmem:[#allocation1 + $0x10] sm:$0xff pattern:$0x73625140] }
  0x2b   : > { %376 = vst [vmem:[#allocation1] ss:$4 sm:$0xff] %v374_v8 }
  0x32   : > { %v381_v13 = vld.sshfl [vmem:[#allocation1 + $0x10] sm:$0xff pattern:$0x73625140]  ;;  %v377_v14 = vld.sshfl [vmem:[#allocation1] sm:$0xff pattern:$0x73625140]  ;;  %313 = vrot.lane.b32.xlu2 %v307_v11, %s1004_s19 }
  0x33   : > { %387 = vrot.lane.b32.xlu1 %v381_v13, %s1005_s20  ;;  %v379_v15 = vld.sshfl [vmem:[#allocation1 + $0x8] sm:$0xff pattern:$0x73625140] }
  0x34   : > { %385 = vrot.lane.b32.xlu0 %v379_v15, %s1005_s20  ;;  %450 = vst [vmem:[#allocation1] ss:$4 sm:$0xff] %v448_v12  ;;  %v946_v15 = vld [vmem:[%s1166_s1 + $0xa] sm:$0x3] }
  0x3a   : > { %383 = vrot.lane.b32.xlu2 %v377_v14, %s1005_s20 }
  0x3b   : > { %v455_v17 = vld.sshfl [vmem:[#allocation1 + $0x10] sm:$0xff pattern:$0x73625140]  ;;  %v453_v18 = vld.sshfl [vmem:[#allocation1 + $0x8] sm:$0xff pattern:$0x73625140] }
  0x3c   : > { %461 = vrot.lane.b32.xlu0 %v455_v17, %s1006_s21  ;;  %v451_v19 = vld.sshfl [vmem:[#allocation1] sm:$0xff pattern:$0x73625140] }
  0x3d   : > { %457 = vrot.lane.b32.xlu1 %v451_v19, %s1006_s21  ;;  %524 = vst [vmem:[#allocation1] ss:$4 sm:$0xff] %v522_v16  ;;  %v942_v16 = vld [vmem:[%s1166_s1 + $0x8] sm:$0x3] }
  0x42   : > { %459 = vrot.lane.b32.xlu2 %v453_v18, %s1006_s21 }
  0x44   : > { %v527_v21 = vld.sshfl [vmem:[#allocation1 + $0x8] sm:$0xff pattern:$0x73625140]  ;;  %v525_v22 = vld.sshfl [vmem:[#allocation1] sm:$0xff pattern:$0x73625140] }
  0x45   : > { %533 = vrot.lane.b32.xlu1 %v527_v21, %s1007_s22  ;;  %531 = vrot.lane.b32.xlu0 %v525_v22, %s1007_s22  ;;  %v529_v23 = vld.sshfl [vmem:[#allocation1 + $0x10] sm:$0xff pattern:$0x73625140] }
  0x46   : > { %598 = vst [vmem:[#allocation1] ss:$4 sm:$0xff] %v596_v20 }
  0x4d   : > { %535 = vrot.lane.b32.xlu1 %v529_v23, %s1007_s22  ;;  %v603_v25 = vld.sshfl [vmem:[#allocation1 + $0x10] sm:$0xff pattern:$0x73625140]  ;;  %v601_v26 = vld.sshfl [vmem:[#allocation1 + $0x8] sm:$0xff pattern:$0x73625140] }
  0x4e   : > { %607 = vrot.lane.b32.xlu0 %v601_v26, %s1008_s23  ;;  %v599_v27 = vld.sshfl [vmem:[#allocation1] sm:$0xff pattern:$0x73625140] }
  0x4f   : > { %605 = vrot.lane.b32.xlu2 %v599_v27, %s1008_s23  ;;  %672 = vst [vmem:[#allocation1] ss:$4 sm:$0xff] %v670_v24 }
  0x56   : > { %v673_v29 = vld.sshfl [vmem:[#allocation1] sm:$0xff pattern:$0x73625140]  ;;  %v677_v30 = vld.sshfl [vmem:[#allocation1 + $0x10] sm:$0xff pattern:$0x73625140] }
  0x57   : > { %683 = vrot.lane.b32.xlu1 %v677_v30, %s1009_s24  ;;  %v675_v31 = vld.sshfl [vmem:[#allocation1 + $0x8] sm:$0xff pattern:$0x73625140]  ;;  %609 = vrot.lane.b32.xlu2 %v603_v25, %s1008_s23 }
  0x58   : > { %681 = vrot.lane.b32.xlu0 %v675_v31, %s1009_s24  ;;  %746 = vst [vmem:[#allocation1] ss:$4 sm:$0xff] %v744_v28 }
  0x5f   : > { %v751_v32 = vld.sshfl [vmem:[#allocation1 + $0x10] sm:$0xff pattern:$0x73625140]  ;;  %v747_v33 = vld.sshfl [vmem:[#allocation1] sm:$0xff pattern:$0x73625140]  ;;  %679 = vrot.lane.b32.xlu2 %v673_v29, %s1009_s24  ;;  %s170_s24 = scalar_lea.vmem %s1168_s3, %s964_s14 }
  0x60   : > { %757 = vrot.lane.b32.xlu0 %v751_v32, %s1010_s25  ;;  %753 = vrot.lane.b32.xlu1 %v747_v33, %s1010_s25  ;;  %v749_v34 = vld.sshfl [vmem:[#allocation1 + $0x8] sm:$0xff pattern:$0x73625140] }
  0x67   : > { %755 = vrot.lane.b32.xlu2 %v749_v34, %s1010_s25  ;;  %v950_v34 = vld [vmem:[%s1166_s1 + $0xc] sm:$0x3] }
  0x84   : > { %v312_v37 = vpop.permute.xlu2 %311 }
  0x8a   : > { %v189_v38 = vpop.permute.xlu0 %188  ;;  %v187_v39 = vpop.permute.xlu1 %186 }
  0x8b   : > { %v192_v40 = vsel %vm190_vm2, %v187_v39, %v189_v38  ;;  %v205_v41 = vsel %vm197_vm0, %v189_v38, 0 }
  0x8c   : > { %v202_v43 = vsel %vm197_vm0, %v192_v40, 0  ;;  %240 = vmatpush.bf16.msra.mxu2 %v205_v41  ;;  %v314_v45 = vpop.permute.xlu2 %313 }
  0x8d   : > { %227 = vmatpush.bf16.msra.mxu1 %v202_v43  ;;  %v317_v46 = vsel %vm315_vm3, %v312_v37, %v314_v45  ;;  %v328_v53 = vsel %vm197_vm0, %v314_v45, 0  ;;  %v816_v45 = vld [vmem:[%s1167_s2] sm:$0xf] }
  0x8e   : > { %v325_v47 = vsel %vm197_vm0, %v317_v46, 0  ;;  %v1011_v46 = vmov 0  }
  0x8f   : > { %930 = vmatmul.msk.bf16.vlgmr.msra.gmra.mxu2 %vm193_vm1, %v927_v44  ;;  %350 = vmatpush.bf16.msrb.mxu3 %v325_v47  ;;  %v954_v47 = vld [vmem:[%s1166_s1 + $0xe] sm:$0x3] }
  0x90   : > { %929 = vmatmul.msk.bf16.vlgmr.msra.gmra.mxu1 %vm193_vm1, %v927_v44  ;;  %982 = vset.pattern.permute.xlu0 %v1011_v46 }
  0x91   : > { %292 = vmatpush.bf16.msrb.mxu1 %v257_v42  ;;  %819 = vperm.xlu0 %982, %v816_v45  }
  0x92   : > { %v185_v49 = vpop.permute.xlu0 %184  ;;  %936 = vmatmul.msk.bf16.vlgmr.msrb.gmra.mxu3 %vm193_vm1, %v934_v48 }
  0x93   : > { %v191_v50 = vsel %vm190_vm2, %v185_v49, %v187_v39 }
  0x94   : > { %v199_v52 = vsel %vm197_vm0, %v191_v50, 0  ;;  %v384_v57 = vpop.permute.xlu2 %383 }
  0x95   : > { %214 = vmatpush.bf16.msra.mxu0 %v199_v52 }
  0x98   : > { %928 = vmatmul.msk.bf16.vlgmr.msra.gmra.mxu0 %vm193_vm1, %v927_v44 }
  0x99   : > { %279 = vmatpush.bf16.msrb.mxu0 %v255_v51 }
  0x9c   : > { %v310_v54 = vpop.permute.xlu1 %309  ;;  %v460_v2 = vpop.permute.xlu2 %459 }
  0x9d   : > { %363 = vmatpush.bf16.msra.mxu0 %v328_v53  ;;  %v316_v55 = vsel %vm315_vm3, %v310_v54, %v312_v37 }
  0x9e   : > { %v322_v56 = vsel %vm197_vm0, %v316_v55, 0 }
  0x9f   : > { %337 = vmatpush.bf16.msrb.mxu2 %v322_v56 }
  0xa0   : > { %933 = vmatmul.msk.bf16.vlgmr.msrb.gmra.mxu1 %vm193_vm1, %v172_v36 }
  0xa2   : > { %935 = vmatmul.msk.bf16.vlgmr.msrb.gmra.mxu2 %vm193_vm1, %v934_v48 }
  0xa5   : > { %v388_v58 = vpop.permute.xlu1 %387 }
  0xa6   : > { %v402_v59 = vsel %vm197_vm0, %v388_v58, 0  ;;  %v386_v60 = vpop.permute.xlu0 %385 }
  0xa7   : > { %v391_v61 = vsel %vm389_vm4, %v386_v60, %v388_v58  ;;  %v390_v62 = vsel %vm389_vm4, %v384_v57, %v386_v60  ;;  %437 = vmatpush.bf16.msra.mxu3 %v402_v59 }
  0xa8   : > { %932 = vmatmul.msk.bf16.vlgmr.msrb.gmra.mxu0 %vm193_vm1, %v172_v36  ;;  %v399_v63 = vsel %vm197_vm0, %v391_v61, 0  ;;  %v396_v0 = vsel %vm197_vm0, %v390_v62, 0  ;;  %v268_v49 = vpop.f32.mrf.mxu3 }
  0xa9   : > { %411 = vmatpush.bf16.msra.mxu1 %v396_v0  ;;  %424 = vmatpush.bf16.msra.mxu2 %v399_v63  ;;  %v606_v10 = vpop.permute.xlu2 %605 }
  0xaa   : > { %941 = vmatmul.msk.bf16.vlgmr.msra.gmra.mxu3 %vm193_vm1, %v938_v1 }
  0xae   : > { %v462_v3 = vpop.permute.xlu0 %461 }
  0xaf   : > { %v476_v4 = vsel %vm197_vm0, %v462_v3, 0  ;;  %v458_v5 = vpop.permute.xlu1 %457  ;;  %v465_v6 = vsel %vm463_vm5, %v460_v2, %v462_v3 }
  0xb0   : > { %939 = vmatmul.msk.bf16.vlgmr.msra.gmra.mxu1 %vm193_vm1, %v938_v1  ;;  %v464_v7 = vsel %vm463_vm5, %v458_v5, %v460_v2  ;;  %v473_v8 = vsel %vm197_vm0, %v465_v6, 0  ;;  %511 = vmatpush.bf16.msrb.mxu2 %v476_v4  ;;  %v270_v50 = vpop.f32.mrf.mxu3 }
  0xb1   : > { %v470_v9 = vsel %vm197_vm0, %v464_v7, 0  ;;  %498 = vmatpush.bf16.msrb.mxu1 %v473_v8  ;;  %v610_v17 = vpop.permute.xlu2 %609 }
  0xb2   : > { %940 = vmatmul.msk.bf16.vlgmr.msra.gmra.mxu2 %vm193_vm1, %v938_v1  ;;  %485 = vmatpush.bf16.msrb.mxu0 %v470_v9  ;;  %v624_v27 = vsel %vm197_vm0, %v610_v17, 0 }
  0xb7   : > { %v534_v11 = vpop.permute.xlu1 %533  ;;  %v532_v12 = vpop.permute.xlu0 %531 }
  0xb8   : > { %937 = vmatmul.msk.bf16.vlgmr.msra.gmra.mxu0 %vm193_vm1, %v934_v48  ;;  %v538_v13 = vsel %vm537_vm6, %v532_v12, %v534_v11  ;;  %v958_v48 = vld [vmem:[%s1166_s1 + $0x10] sm:$0x3] }
  0xb9   : > { %v544_v14 = vsel %vm197_vm0, %v538_v13, 0  ;;  %v680_v28 = vpop.permute.xlu2 %679 }
  0xba   : > { %559 = vmatpush.bf16.msrb.mxu3 %v544_v14 }
  0xbd   : > { %947 = vmatmul.msk.bf16.vlgmr.msrb.gmra.mxu3 %vm193_vm1, %v946_v15 }
  0xbf   : > { %v536_v18 = vpop.permute.xlu1 %535 }
  0xc0   : > { %944 = vmatmul.msk.bf16.vlgmr.msrb.gmra.mxu1 %vm193_vm1, %v942_v16  ;;  %v539_v19 = vsel %vm537_vm6, %v534_v11, %v536_v18  ;;  %v550_v20 = vsel %vm197_vm0, %v536_v18, 0  ;;  %v608_v21 = vpop.permute.xlu0 %607 }
  0xc1   : > { %v547_v22 = vsel %vm197_vm0, %v539_v19, 0  ;;  %v612_v23 = vsel %vm611_vm7, %v606_v10, %v608_v21  ;;  %v613_v24 = vsel %vm611_vm7, %v608_v21, %v610_v17  ;;  %585 = vmatpush.bf16.msra.mxu1 %v550_v20  ;;  %v756_v37 = vpop.permute.xlu2 %755 }
  0xc2   : > { %945 = vmatmul.msk.bf16.vlgmr.msrb.gmra.mxu2 %vm193_vm1, %v942_v16  ;;  %v618_v25 = vsel %vm197_vm0, %v612_v23, 0  ;;  %v621_v26 = vsel %vm197_vm0, %v613_v24, 0  ;;  %572 = vmatpush.bf16.msra.mxu0 %v547_v22 }
  0xc3   : > { %633 = vmatpush.bf16.msra.mxu2 %v618_v25  ;;  %646 = vmatpush.bf16.msra.mxu3 %v621_v26 }
  0xc8   : > { %943 = vmatmul.msk.bf16.vlgmr.msrb.gmra.mxu0 %vm193_vm1, %v942_v16 }
  0xc9   : > { %659 = vmatpush.bf16.msrb.mxu0 %v624_v27  ;;  %v684_v29 = vpop.permute.xlu1 %683 }
  0xca   : > { %v698_v30 = vsel %vm197_vm0, %v684_v29, 0  ;;  %v682_v31 = vpop.permute.xlu0 %681 }
  0xcb   : > { %v687_v32 = vsel %vm685_vm8, %v682_v31, %v684_v29  ;;  %v686_v33 = vsel %vm685_vm8, %v680_v28, %v682_v31  ;;  %733 = vmatpush.bf16.msrb.mxu3 %v698_v30 }
  0xcc   : > { %v695_v35 = vsel %vm197_vm0, %v687_v32, 0  ;;  %v692_v36 = vsel %vm197_vm0, %v686_v33, 0 }
  0xcd   : > { %952 = vmatmul.msk.bf16.vlgmr.msra.gmra.mxu3 %vm193_vm1, %v950_v34  ;;  %707 = vmatpush.bf16.msrb.mxu1 %v692_v36 }
  0xce   : > { %720 = vmatpush.bf16.msrb.mxu2 %v695_v35 }
  0xd0   : > { %949 = vmatmul.msk.bf16.vlgmr.msra.gmra.mxu1 %vm193_vm1, %v946_v15 }
  0xd2   : > { %951 = vmatmul.msk.bf16.vlgmr.msra.gmra.mxu2 %vm193_vm1, %v950_v34  ;;  %v758_v38 = vpop.permute.xlu0 %757  ;;  %v754_v39 = vpop.permute.xlu1 %753 }
  0xd3   : > { %v772_v40 = vsel %vm197_vm0, %v758_v38, 0  ;;  %v761_v41 = vsel %vm759_vm9, %v756_v37, %v758_v38  ;;  %v760_v42 = vsel %vm759_vm9, %v754_v39, %v756_v37 }
  0xd4   : > { %v769_v43 = vsel %vm197_vm0, %v761_v41, 0  ;;  %807 = vmatpush.bf16.msra.mxu2 %v772_v40  ;;  %v766_v44 = vsel %vm197_vm0, %v760_v42, 0 }
  0xd5   : > { %794 = vmatpush.bf16.msra.mxu1 %v769_v43 }
  0xd8   : > { %948 = vmatmul.msk.bf16.vlgmr.msra.gmra.mxu0 %vm193_vm1, %v946_v15 }
  0xd9   : > { %781 = vmatpush.bf16.msra.mxu0 %v766_v44 }
  0xdd   : > { %957 = vmatmul.msk.bf16.vlgmr.msrb.gmra.mxu3 %vm193_vm1, %v954_v47 }
  0xe0   : > { %955 = vmatmul.msk.bf16.vlgmr.msrb.gmra.mxu1 %vm193_vm1, %v954_v47 }
  0xe2   : > { %956 = vmatmul.msk.bf16.vlgmr.msrb.gmra.mxu2 %vm193_vm1, %v954_v47 }
  0xe8   : > { %953 = vmatmul.msk.bf16.vlgmr.msrb.gmra.mxu0 %vm193_vm1, %v950_v34 }
  0xf0   : > { %960 = vmatmul.msk.bf16.vlgmr.msra.gmra.mxu1 %vm193_vm1, %v958_v48 }
  0xf2   : > { %961 = vmatmul.msk.bf16.vlgmr.msra.gmra.mxu2 %vm193_vm1, %v958_v48 }
  0xf8   : > { %959 = vmatmul.msk.bf16.vlgmr.msra.gmra.mxu0 %vm193_vm1, %v958_v48 }
 0x103   : > { %v820_v50 = vpop.permute.xlu0 %819 }
 0x10d   : > { %v229_v51 = vpop.f32.mrf.mxu1 }
 0x112   : > { %v242_v52 = vpop.f32.mrf.mxu2 }
 0x115   : > { %v216_v53 = vpop.f32.mrf.mxu0  ;;  %v231_v54 = vpop.f32.mrf.mxu1 }
 0x116   : > { %v269_v55 = vadd.f32 %v268_v49, %v216_v53  ;;  %v352_v56 = vpop.f32.mrf.mxu3 }
 0x11a   : > { %v244_v57 = vpop.f32.mrf.mxu2 }
 0x11d   : > { %v218_v58 = vpop.f32.mrf.mxu0  ;;  %v294_v59 = vpop.f32.mrf.mxu1 }
 0x11e   : > { %v295_v60 = vadd.f32 %v294_v59, %v242_v52  ;;  %v354_v61 = vpop.f32.mrf.mxu3 }
 0x125   : > { %v339_v62 = vpop.f32.mrf.mxu2  ;;  %v281_v63 = vpop.f32.mrf.mxu0 }
 0x126   : > { %v369_v0 = vadd.f32 %v339_v62, %v269_v55  ;;  %v282_v1 = vadd.f32 %v281_v63, %v229_v51  ;;  %v296_v2 = vpop.f32.mrf.mxu1 }
 0x128   : > { %v370_v3 = vadd.f32 %v352_v56, %v282_v1 }
 0x12d   : > { %v341_v4 = vpop.f32.mrf.mxu2  ;;  %v283_v5 = vpop.f32.mrf.mxu0 }
 0x12e   : > { %v413_v6 = vpop.f32.mrf.mxu1  ;;  %v439_v7 = vpop.f32.mrf.mxu3 }
 0x12f   : > { %v443_v40 = vadd.f32 %v413_v6, %v369_v0 }
 0x135   : > { %v426_v8 = vpop.f32.mrf.mxu2  ;;  %v365_v9 = vpop.f32.mrf.mxu0 }
 0x136   : > { %v415_v10 = vpop.f32.mrf.mxu1  ;;  %v441_v11 = vpop.f32.mrf.mxu3  ;;  %v444_v32 = vadd.f32 %v426_v8, %v370_v3  ;;  %v371_v36 = vadd.f32 %v365_v9, %v295_v60 }
 0x138   : > { %v445_v41 = vadd.f32 %v439_v7, %v371_v36 }
 0x13d   : > { %v428_v12 = vpop.f32.mrf.mxu2  ;;  %v367_v13 = vpop.f32.mrf.mxu0 }
 0x13e   : > { %v500_v14 = vpop.f32.mrf.mxu1 }
 0x13f   : > { %v518_v33 = vadd.f32 %v500_v14, %v444_v32 }
 0x140   : > { %v561_v15 = vpop.f32.mrf.mxu3 }
 0x145   : > { %v513_v16 = vpop.f32.mrf.mxu2  ;;  %v487_v17 = vpop.f32.mrf.mxu0 }
 0x146   : > { %v502_v18 = vpop.f32.mrf.mxu1  ;;  %v519_v43 = vadd.f32 %v513_v16, %v445_v41  ;;  %v517_v44 = vadd.f32 %v487_v17, %v443_v40 }
 0x148   : > { %v563_v19 = vpop.f32.mrf.mxu3  ;;  %v591_v52 = vadd.f32 %v561_v15, %v517_v44 }
 0x14d   : > { %v515_v20 = vpop.f32.mrf.mxu2  ;;  %v489_v21 = vpop.f32.mrf.mxu0 }
 0x14e   : > { %v587_v22 = vpop.f32.mrf.mxu1 }
 0x14f   : > { %v593_v48 = vadd.f32 %v587_v22, %v519_v43 }
 0x150   : > { %v648_v23 = vpop.f32.mrf.mxu3 }
 0x155   : > { %v635_v24 = vpop.f32.mrf.mxu2  ;;  %v574_v25 = vpop.f32.mrf.mxu0 }
 0x156   : > { %v589_v26 = vpop.f32.mrf.mxu1  ;;  %v592_v38 = vadd.f32 %v574_v25, %v518_v33  ;;  %v665_v55 = vadd.f32 %v635_v24, %v591_v52 }
 0x158   : > { %v650_v27 = vpop.f32.mrf.mxu3  ;;  %v666_v42 = vadd.f32 %v648_v23, %v592_v38 }
 0x15d   : > { %v637_v28 = vpop.f32.mrf.mxu2  ;;  %v576_v29 = vpop.f32.mrf.mxu0 }
 0x15e   : > { %v709_v30 = vpop.f32.mrf.mxu1 }
 0x15f   : > { %v739_v57 = vadd.f32 %v709_v30, %v665_v55 }
 0x160   : > { %v735_v31 = vpop.f32.mrf.mxu3 }
 0x165   : > { %v722_v34 = vpop.f32.mrf.mxu2  ;;  %v661_v35 = vpop.f32.mrf.mxu0 }
 0x166   : > { %v711_v37 = vpop.f32.mrf.mxu1  ;;  %v740_v45 = vadd.f32 %v722_v34, %v666_v42  ;;  %v667_v53 = vadd.f32 %v661_v35, %v593_v48 }
 0x168   : > { %v737_v39 = vpop.f32.mrf.mxu3  ;;  %v741_v58 = vadd.f32 %v735_v31, %v667_v53 }
 0x16d   : > { %v724_v46 = vpop.f32.mrf.mxu2  ;;  %v663_v47 = vpop.f32.mrf.mxu0 }
 0x16e   : > { %v796_v49 = vpop.f32.mrf.mxu1 }
 0x16f   : > { %v814_v51 = vadd.f32 %v796_v49, %v740_v45 }
 0x171   : > { %v823_v54 = vadd.f32 %v820_v50, %v814_v51 }
 0x173   : > { %v826_v56 = vsub.f32 0.0, %v823_v54 }
 0x175   : > { %v830_v59 = vmul.f32 1.442695, %v826_v56  ;;  %v809_v60 = vpop.f32.mrf.mxu2  ;;  %v783_v61 = vpop.f32.mrf.mxu0 }
 0x176   : > { %v815_v62 = vadd.f32 %v809_v60, %v741_v58  ;;  %v813_v63 = vadd.f32 %v783_v61, %v739_v57  ;;  %v798_v0 = vpop.f32.mrf.mxu1 }
 0x177   : > { %983 = vpow2.f32 %v830_v59 }
 0x178   : > { %v824_v1 = vadd.f32 %v820_v50, %v815_v62  ;;  %v822_v2 = vadd.f32 %v820_v50, %v813_v63 }
 0x17a   : > { %v827_v3 = vsub.f32 0.0, %v824_v1  ;;  %v825_v4 = vsub.f32 0.0, %v822_v2 }
 0x17c   : > { %v832_v5 = vmul.f32 1.442695, %v827_v3  ;;  %v828_v6 = vmul.f32 1.442695, %v825_v4 }
 0x17d   : > { %v785_v7 = vpop.f32.mrf.mxu0  ;;  %v811_v8 = vpop.f32.mrf.mxu2 }
 0x17e   : > { %985 = vpow2.f32 %v832_v5  ;;  %v984_v9 = vpop.eup %983 }
 0x17f   : > { %987 = vpow2.f32 %v828_v6  ;;  %v835_v10 = vadd.f32 1.0, %v984_v9 }
 0x181   : > { %989 = vrcp.f32 %v835_v10 }
 0x184   : > { %v986_v11 = vpop.eup %985 }
 0x185   : > { %v988_v12 = vpop.eup %987  ;;  %v836_v13 = vadd.f32 1.0, %v986_v11 }
 0x186   : > { %v834_v14 = vadd.f32 1.0, %v988_v12 }
 0x187   : > { %991 = vrcp.f32 %v836_v13  ;;  %v990_v15 = vpop.eup %989 }
 0x188   : > { %993 = vrcp.f32 %v834_v14  ;;  %v841_v19 = vmul.f32 %v990_v15, %v823_v54 }
 0x18d   : > { %v992_v16 = vpop.eup %991 }
 0x18e   : > { %v994_v17 = vpop.eup %993  ;;  %v842_v18 = vmul.f32 %v992_v16, %v824_v1 }
 0x18f   : > { %v840_v20 = vmul.f32 %v994_v17, %v822_v2 }
 0x190   : > { %v844_v21 = vpack.c.bf16 %v842_v18, %v842_v18 }
 0x191   : > { %v843_v22 = vpack.c.bf16 %v841_v19, %v840_v20 }
 0x192   : > { %v848_v23 = vrot.slane %v844_v21, 4  ;;  %v849_v24 = vrot.slane %v844_v21, 6 }
 0x193   : > { %v847_v25 = vrot.slane %v843_v22, 2 }
 0x194   : > { %v856_v26 = vsel %vm853_vm13, %v848_v23, %v849_v24 }
 0x195   : > { %v852_v27 = vsel %vm197_vm0, %v843_v22, %v847_v25 }
 0x196   : > { %v858_v28 = vsel %vm857_vm14, %v852_v27, %v856_v26 }
 0x197   : > { %864 = vst.msk [vmem:[%s170_s24] sm:$0x3f] %vm863_vm15, %v858_v28 }
 0x198 PF: > { %s13_s12 = sadd.s32 1, %s1001_s12  }
 0x199   : > { %p10_p4 = scmp.ge.s32.totalorder %s13_s12, 4  }
 0x19b   :  { %12 = sbr.rel (!%p10_p4) target bundleno = 1 (0x1), region = 70 }

// kernel: sppfcspc_forward.11
= control target key start
LH: loop header
LB: loop body
LE: loop exit
PB: predicated region body
PF: predicated region fallthrough
CT: control target
= control target key end

     0   :  { %s1541_s6 = smov 0   ;;  %s1959_s0 = inlined_call_operand.vmem [shape: bf16[2,4,796], index: 0, kind: input, shape index: {}]   ;;  %s1960_s1 = inlined_call_operand.vmem [shape: bf16[2,12,448], index: 1, kind: output, shape index: {}]  }
   0x1 LB: > { %s1178_s7 = sadd.s32 4294967295, %s1519_s6   ;;  %p1182_p0 = scmp.ge.s32.totalorder %s1519_s6, 1  ;;  %s1519_s6 = sphi %s1541_s6, %s11_s6  }
   0x2   : > { %p87_p1 = scmp.lt.s32.totalorder %s1519_s6, 3 }
   0x4   : > { %p88_p2 = pnand %p1182_p0, %p87_p1 }
   0x5   : > { %p107_p3 = scmp.lt.s32.totalorder (!%p88_p2), %s1178_s7, 1  ;;  %s1521_s12 = smov (!%p88_p2), 127  }
   0x6   : > { %91 = sbr.rel (%p88_p2) target bundleno = 1063 (0x427), region = 24  ;;  %s1522_s13 = smov (!%p88_p2), 126  }
   0x7   : > { %s1523_s14 = smov (!%p88_p2), 125   ;;  %s1524_s15 = smov (!%p88_p2), 124  }
   0x8   : > { %s1525_s16 = smov (!%p88_p2), 100   ;;  %s1526_s17 = smov (!%p88_p2), 72  }
   0x9   : > { %s1527_s18 = smov (!%p88_p2), 44   ;;  %s1528_s19 = smov (!%p88_p2), 16  }
   0xa   : > { %s1529_s20 = smov (!%p88_p2), 12   ;;  %s1530_s25 = smov (!%p88_p2), 70  }
   0xb   : > { %s1962_s7 = smov (!%p107_p3, %s1178_s7), 1  ;;  %vm139_vm0 = vcmask 1043456   ;;  %vm141_vm1 = vcmask 1039360   ;;  %vm219_vm2 = vcmask 1031168   ;;  %vm279_vm3 = vcmask 1022976  }
   0xc   : > { %s1189_s8 = smul.u32 14, %s1962_s7  ;;  %vm339_vm4 = vcmask 1014784   ;;  %vm388_vm5 = vcmask 818176   ;;  %vm427_vm6 = vcmask 588800   ;;  %vm466_vm7 = vcmask 359424   ;;  %s1188_s21 = sshll.u32 %s1962_s7, 5 }
   0xd   : > { %vm509_vm8 = vcmask 130048   ;;  %vm1089_vm9 = vcmask 97280   ;;  %s1893_s24 = scalar_lea.vmem %s1960_s1, %s1188_s21  ;;  %vm1117_vm10 = vcmask 1043458   ;;  %vm1118_vm11 = vcmask 523270  }
   0xe   : > { %s111_s11 = scalar_lea.vmem %s1959_s0, %s1189_s8  ;;  %vm1111_vm12 = vcmask 572416   ;;  %vm1119_vm13 = vmor %vm1118_vm11, %vm1117_vm10  ;;  %vm1096_vm14 = vcmask 1041408   ;;  %vm1097_vm15 = vcmask 521220  }
   0xf   : > { %v117_v0 = vld [vmem:[%s111_s11] sm:$0xff]  ;;  %v118_v3 = vld [vmem:[%s111_s11 + $0x8] sm:$0x3f] }
  0x10   : > { %v1555_v1 = vunpack.c.l.bf16 %v117_v0  ;;  %v1557_v2 = vunpack.c.h.bf16 %v117_v0  ;;  %v1562_v5 = vunpack.c.l.bf16 %v118_v3  ;;  %v122_v6 = vunpack.c.h.bf16 %v118_v3 }
  0x12   : > { %v1208_v4 = vpack.i.bf16 %v1557_v2, %v1555_v1  ;;  %v1213_v7 = vpack.i.bf16 %v122_v6, %v1562_v5 }
  0x14   : > { %1209 = vrot.lane.b32.xlu0 %v1208_v4, %s1521_s12 }
  0x1c   : > { %1214 = vrot.lane.b32.xlu0 %v1213_v7, %s1521_s12 }
  0x86   : > { %v1210_v8 = vpop.permute.xlu0 %1209 }
  0x87   : > { %v1212_v9 = vunpack.i.h.bf16 %v1210_v8  ;;  %v1211_v10 = vunpack.i.l.bf16 %v1210_v8 }
  0x89   : > { %v136_v11 = vrot.slane %v1212_v9, 4  ;;  %v135_v12 = vrot.slane %v1211_v10, 4 }
  0x8b   : > { %v140_v13 = vsel %vm139_vm0, %v135_v12, %v136_v11 }
  0x8c   : > { %v142_v14 = vsel %vm141_vm1, %v1211_v10, %v140_v13 }
  0x8d   : > { %v151_v15 = vmax.f32 %v1555_v1, %v142_v14 }
  0x8e   : > { %v1215_v16 = vpop.permute.xlu0 %1214 }
  0x8f   : > { %159 = vst [vmem:[#allocation1] ss:$2 sm:$0xff] %v151_v15  ;;  %v1217_v17 = vunpack.i.h.bf16 %v1215_v16  ;;  %v1216_v18 = vunpack.i.l.bf16 %v1215_v16 }
  0x91   : > { %v138_v19 = vrot.slane %v1217_v17, 4  ;;  %v154_v20 = vmax.f32 %v122_v6, %v1217_v17  ;;  %v137_v21 = vrot.slane %v1216_v18, 4 }
  0x93   : > { %165 = vst [vmem:[#allocation1 + $0x30] ss:$2 sm:$0xff] %v154_v20  ;;  %v143_v22 = vsel %vm139_vm0, %v136_v11, %v137_v21  ;;  %v145_v23 = vsel %vm139_vm0, %v137_v21, %v138_v19 }
  0x94   : > { %v144_v24 = vsel %vm141_vm1, %v1212_v9, %v143_v22  ;;  %v146_v25 = vsel %vm141_vm1, %v1216_v18, %v145_v23 }
  0x95   : > { %v152_v26 = vmax.f32 %v1557_v2, %v144_v24  ;;  %v153_v27 = vmax.f32 %v1562_v5, %v146_v25 }
  0x96   : > { %v1575_v28 = vld.sshfl [vmem:[#allocation1] sm:$0xff pattern:$0x75316420]  ;;  %v1577_v29 = vld.sshfl [vmem:[#allocation1 + $0x8] sm:$0xff pattern:$0x75316420] }
  0x97   : > { %191 = vst [vmem:[#allocation1] ss:$2 sm:$0xff] %v1555_v1 }
  0x98   : > { %161 = vst [vmem:[#allocation1 + $0x10] ss:$2 sm:$0xff] %v152_v26 }
  0x99   : > { %163 = vst [vmem:[#allocation1 + $0x20] ss:$2 sm:$0xff] %v153_v27 }
  0x9a   : > { %v1580_v30 = vld.sshfl [vmem:[#allocation1 + $0x30] sm:$0xff pattern:$0x75316420] }
  0x9b   : > { %197 = vst [vmem:[#allocation1 + $0x30] ss:$2 sm:$0xff] %v122_v6 }
  0x9e   : > { %v198_v31 = vld.sshfl [vmem:[#allocation1] sm:$0xff pattern:$0x75316420]  ;;  %v199_v32 = vld.sshfl [vmem:[#allocation1 + $0x8] sm:$0xff pattern:$0x75316420] }
  0x9f   : > { %v1582_v33 = vld.sshfl [vmem:[#allocation1 + $0x10] sm:$0xff pattern:$0x75316420]  ;;  %v1584_v34 = vld.sshfl [vmem:[#allocation1 + $0x18] sm:$0xff pattern:$0x75316420]  ;;  %v1218_v35 = vpack.i.bf16 %v199_v32, %v198_v31 }
  0xa0   : > { %v1586_v36 = vld.sshfl [vmem:[#allocation1 + $0x20] sm:$0xff pattern:$0x75316420]  ;;  %v1588_v37 = vld.sshfl [vmem:[#allocation1 + $0x28] sm:$0xff pattern:$0x75316420] }
  0xa1   : > { %193 = vst [vmem:[#allocation1 + $0x10] ss:$2 sm:$0xff] %v1557_v2  ;;  %1219 = vrot.lane.b32.xlu1 %v1218_v35, %s1522_s13 }
  0xa2   : > { %195 = vst [vmem:[#allocation1 + $0x20] ss:$2 sm:$0xff] %v1562_v5  ;;  %v204_v38 = vld.sshfl [vmem:[#allocation1 + $0x30] sm:$0xff pattern:$0x75316420] }
  0xa3   : > { %251 = vst [vmem:[#allocation1] ss:$2 sm:$0xff] %v1555_v1  ;;  %217 = vrot.lane.b32.xlu2 %v204_v38, %s1522_s13 }
  0xa4   : > { %257 = vst [vmem:[#allocation1 + $0x30] ss:$2 sm:$0xff] %v122_v6 }
  0xa8   : > { %v200_v39 = vld.sshfl [vmem:[#allocation1 + $0x10] sm:$0xff pattern:$0x75316420]  ;;  %v201_v40 = vld.sshfl [vmem:[#allocation1 + $0x18] sm:$0xff pattern:$0x75316420] }
  0xa9   : > { %v1223_v41 = vpack.i.bf16 %v201_v40, %v200_v39  ;;  %253 = vst [vmem:[#allocation1 + $0x10] ss:$2 sm:$0xff] %v1557_v2  ;;  %v202_v42 = vld.sshfl [vmem:[#allocation1 + $0x20] sm:$0xff pattern:$0x75316420] }
  0xaa   : > { %v203_v43 = vld.sshfl [vmem:[#allocation1 + $0x28] sm:$0xff pattern:$0x75316420]  ;;  %v258_v44 = vld.sshfl [vmem:[#allocation1] sm:$0xff pattern:$0x75316420] }
  0xab   : > { %1224 = vrot.lane.b32.xlu1 %v1223_v41, %s1522_s13  ;;  %v264_v45 = vld.sshfl [vmem:[#allocation1 + $0x30] sm:$0xff pattern:$0x75316420]  ;;  %v1228_v46 = vpack.i.bf16 %v203_v43, %v202_v42  ;;  %255 = vst [vmem:[#allocation1 + $0x20] ss:$2 sm:$0xff] %v1562_v5 }
  0xac   : > { %277 = vrot.lane.b32.xlu0 %v264_v45, %s1523_s14  ;;  %317 = vst [vmem:[#allocation1 + $0x30] ss:$2 sm:$0xff] %v122_v6  ;;  %v259_v47 = vld.sshfl [vmem:[#allocation1 + $0x8] sm:$0xff pattern:$0x75316420] }
  0xad   : > { %1229 = vrot.lane.b32.xlu2 %v1228_v46, %s1522_s13  ;;  %311 = vst [vmem:[#allocation1] ss:$2 sm:$0xff] %v1555_v1  ;;  %v1233_v50 = vpack.i.bf16 %v259_v47, %v258_v44 }
  0xb0   : > { %v260_v48 = vld.sshfl [vmem:[#allocation1 + $0x10] sm:$0xff pattern:$0x75316420]  ;;  %v261_v49 = vld.sshfl [vmem:[#allocation1 + $0x18] sm:$0xff pattern:$0x75316420] }
  0xb1   : > { %v1238_v51 = vpack.i.bf16 %v261_v49, %v260_v48  ;;  %313 = vst [vmem:[#allocation1 + $0x10] ss:$2 sm:$0xff] %v1557_v2 }
  0xb2   : > { %v262_v52 = vld.sshfl [vmem:[#allocation1 + $0x20] sm:$0xff pattern:$0x75316420]  ;;  %v263_v53 = vld.sshfl [vmem:[#allocation1 + $0x28] sm:$0xff pattern:$0x75316420] }
  0xb3   : > { %1239 = vrot.lane.b32.xlu1 %v1238_v51, %s1523_s14  ;;  %v1243_v54 = vpack.i.bf16 %v263_v53, %v262_v52  ;;  %315 = vst [vmem:[#allocation1 + $0x20] ss:$2 sm:$0xff] %v1562_v5  ;;  %v324_v0 = vld.sshfl [vmem:[#allocation1 + $0x30] sm:$0xff pattern:$0x75316420] }
  0xb4   : > { %1234 = vrot.lane.b32.xlu0 %v1233_v50, %s1523_s14  ;;  %v318_v55 = vld.sshfl [vmem:[#allocation1] sm:$0xff pattern:$0x75316420]  ;;  %v319_v56 = vld.sshfl [vmem:[#allocation1 + $0x8] sm:$0xff pattern:$0x75316420] }
  0xb5   : > { %1244 = vrot.lane.b32.xlu2 %v1243_v54, %s1523_s14  ;;  %v1248_v57 = vpack.i.bf16 %v319_v56, %v318_v55 }
  0xb8   : > { %v320_v58 = vld.sshfl [vmem:[#allocation1 + $0x10] sm:$0xff pattern:$0x75316420]  ;;  %v321_v59 = vld.sshfl [vmem:[#allocation1 + $0x18] sm:$0xff pattern:$0x75316420] }
  0xb9   : > { %v1253_v60 = vpack.i.bf16 %v321_v59, %v320_v58 }
  0xba   : > { %v322_v61 = vld.sshfl [vmem:[#allocation1 + $0x20] sm:$0xff pattern:$0x75316420]  ;;  %v323_v62 = vld.sshfl [vmem:[#allocation1 + $0x28] sm:$0xff pattern:$0x75316420] }
  0xbb   : > { %1249 = vrot.lane.b32.xlu1 %v1248_v57, %s1524_s15  ;;  %v1258_v63 = vpack.i.bf16 %v323_v62, %v322_v61 }
  0xbd   : > { %1259 = vrot.lane.b32.xlu0 %v1258_v63, %s1524_s15  ;;  %1254 = vrot.lane.b32.xlu2 %v1253_v60, %s1524_s15 }
  0xc3   : > { %337 = vrot.lane.b32.xlu1 %v324_v0, %s1524_s15 }
  0xfd   : > { %v1610_v1 = vpop.permute.xlu2 %217 }
 0x107   : > { %v1230_v3 = vpop.permute.xlu2 %1229 }
 0x108   : > { %v1232_v13 = vunpack.i.h.bf16 %v1230_v3  ;;  %v1231_v14 = vunpack.i.l.bf16 %v1230_v3 }
 0x10a   : > { %v224_v25 = vsel %vm219_vm2, %v1231_v14, %v1232_v13  ;;  %v225_v27 = vsel %vm219_vm2, %v1232_v13, %v1610_v1 }
 0x10b   : > { %v237_v58 = vmax.f32 %v1586_v36, %v224_v25  ;;  %v238_v59 = vmax.f32 %v1588_v37, %v225_v27 }
 0x10f   : > { %v1245_v6 = vpop.permute.xlu2 %1244 }
 0x110   : > { %v1246_v26 = vunpack.i.l.bf16 %v1245_v6  ;;  %v1247_v39 = vunpack.i.h.bf16 %v1245_v6 }
 0x113   : > { %v1220_v2 = vpop.permute.xlu1 %1219 }
 0x114   : > { %v1222_v7 = vunpack.i.h.bf16 %v1220_v2  ;;  %v1221_v8 = vunpack.i.l.bf16 %v1220_v2 }
 0x116   : > { %v220_v20 = vsel %vm219_vm2, %v1221_v8, %v1222_v7 }
 0x117   : > { %v1255_v15 = vpop.permute.xlu2 %1254  ;;  %v233_v40 = vmax.f32 %v1575_v28, %v220_v20 }
 0x118   : > { %v1257_v23 = vunpack.i.h.bf16 %v1255_v15  ;;  %v1256_v24 = vunpack.i.l.bf16 %v1255_v15 }
 0x11a   : > { %v342_v45 = vsel %vm339_vm4, %v1256_v24, %v1257_v23 }
 0x11d   : > { %v1225_v4 = vpop.permute.xlu1 %1224 }
 0x11e   : > { %v1612_v5 = vpop.permute.xlu0 %277  ;;  %v1227_v10 = vunpack.i.h.bf16 %v1225_v4  ;;  %v1226_v11 = vunpack.i.l.bf16 %v1225_v4 }
 0x120   : > { %v221_v21 = vsel %vm219_vm2, %v1222_v7, %v1226_v11  ;;  %v222_v22 = vsel %vm219_vm2, %v1226_v11, %v1227_v10  ;;  %v223_v31 = vsel %vm219_vm2, %v1227_v10, %v1231_v14 }
 0x121   : > { %v234_v41 = vmax.f32 %v1577_v29, %v221_v21  ;;  %v235_v42 = vmax.f32 %v1582_v33, %v222_v22  ;;  %v236_v48 = vmax.f32 %v1584_v34, %v223_v31  ;;  %v284_v33 = vsel %vm279_vm3, %v1246_v26, %v1247_v39 }
 0x122   : > { %v285_v34 = vsel %vm279_vm3, %v1247_v39, %v1612_v5  ;;  %v297_v2 = vmax.f32 %v237_v58, %v284_v33 }
 0x123   : > { %v298_v3 = vmax.f32 %v238_v59, %v285_v34 }
 0x125   : > { %v1240_v9 = vpop.permute.xlu1 %1239 }
 0x126   : > { %v1235_v12 = vpop.permute.xlu0 %1234  ;;  %v1242_v16 = vunpack.i.h.bf16 %v1240_v9  ;;  %v1241_v17 = vunpack.i.l.bf16 %v1240_v9 }
 0x127   : > { %v1237_v18 = vunpack.i.h.bf16 %v1235_v12  ;;  %v1236_v19 = vunpack.i.l.bf16 %v1235_v12 }
 0x128   : > { %v282_v32 = vsel %vm279_vm3, %v1241_v17, %v1242_v16  ;;  %v283_v44 = vsel %vm279_vm3, %v1242_v16, %v1246_v26 }
 0x129   : > { %v281_v35 = vsel %vm279_vm3, %v1237_v18, %v1241_v17  ;;  %v280_v38 = vsel %vm279_vm3, %v1236_v19, %v1237_v18  ;;  %v295_v49 = vmax.f32 %v235_v42, %v282_v32  ;;  %v296_v55 = vmax.f32 %v236_v48, %v283_v44 }
 0x12a   : > { %v294_v50 = vmax.f32 %v234_v41, %v281_v35  ;;  %v293_v51 = vmax.f32 %v233_v40, %v280_v38  ;;  %v239_v18 = vmax.f32 %v1580_v30, %v1610_v1 }
 0x12b   : > { %v355_v61 = vmax.f32 %v295_v49, %v342_v45 }
 0x12c   : > { %v299_v19 = vmax.f32 %v239_v18, %v1612_v5 }
 0x12d   : > { %v1250_v43 = vpop.permute.xlu1 %1249 }
 0x12e   : > { %v1252_v46 = vunpack.i.h.bf16 %v1250_v43  ;;  %v1251_v47 = vunpack.i.l.bf16 %v1250_v43 }
 0x12f   : > { %v1260_v52 = vpop.permute.xlu0 %1259 }
 0x130   : > { %v341_v53 = vsel %vm339_vm4, %v1252_v46, %v1256_v24  ;;  %v340_v28 = vsel %vm339_vm4, %v1251_v47, %v1252_v46  ;;  %v1262_v29 = vunpack.i.h.bf16 %v1260_v52  ;;  %v1261_v54 = vunpack.i.l.bf16 %v1260_v52 }
 0x131   : > { %v354_v56 = vmax.f32 %v294_v50, %v341_v53  ;;  %v353_v57 = vmax.f32 %v293_v51, %v340_v28 }
 0x132   : > { %v343_v60 = vsel %vm339_vm4, %v1257_v23, %v1261_v54  ;;  %v344_v63 = vsel %vm339_vm4, %v1261_v54, %v1262_v29 }
 0x133   : > { %v1638_v62 = vpack.c.bf16 %v354_v56, %v353_v57  ;;  %v356_v0 = vmax.f32 %v296_v55, %v343_v60  ;;  %v357_v7 = vmax.f32 %v297_v2, %v344_v63 }
 0x135   : > { %v364_v4 = vunpack.c.l.bf16 %v1638_v62  ;;  %v365_v6 = vunpack.c.h.bf16 %v1638_v62  ;;  %v1643_v36 = vpack.c.bf16 %v356_v0, %v355_v61  ;;  %v338_v37 = vpop.permute.xlu1 %337 }
 0x136   : > { %v345_v8 = vsel %vm339_vm4, %v1262_v29, %v338_v37  ;;  %v359_v20 = vmax.f32 %v299_v19, %v338_v37 }
 0x137   : > { %v366_v9 = vunpack.c.l.bf16 %v1643_v36  ;;  %v367_v10 = vunpack.c.h.bf16 %v1643_v36  ;;  %v358_v11 = vmax.f32 %v298_v3, %v345_v8  ;;  %v1263_v12 = vpack.i.bf16 %v365_v6, %v364_v4 }
 0x138   : > { %v363_v21 = vpack.c.bf16 %v359_v20, %v359_v20 }
 0x139   : > { %v1650_v13 = vpack.c.bf16 %v358_v11, %v357_v7  ;;  %1264 = vrot.lane.b32.xlu2 %v1263_v12, %s1525_s16  ;;  %v1268_v14 = vpack.i.bf16 %v367_v10, %v366_v9 }
 0x13a   : > { %v493_v22 = vunpack.c.l.bf16 %v363_v21 }
 0x13b   : > { %v368_v15 = vunpack.c.l.bf16 %v1650_v13  ;;  %v369_v16 = vunpack.c.h.bf16 %v1650_v13  ;;  %1269 = vrot.lane.b32.xlu0 %v1268_v14, %s1525_s16 }
 0x13d   : > { %v1273_v17 = vpack.i.bf16 %v369_v16, %v368_v15 }
 0x13f   : > { %1274 = vrot.lane.b32.xlu1 %v1273_v17, %s1525_s16 }
 0x141   : > { %1279 = vrot.lane.b32.xlu2 %v1263_v12, %s1526_s17 }
 0x143   : > { %1284 = vrot.lane.b32.xlu0 %v1268_v14, %s1526_s17 }
 0x147   : > { %1289 = vrot.lane.b32.xlu1 %v1273_v17, %s1526_s17 }
 0x149   : > { %1294 = vrot.lane.b32.xlu2 %v1263_v12, %s1527_s18 }
 0x14b   : > { %1299 = vrot.lane.b32.xlu0 %v1268_v14, %s1527_s18 }
 0x14f   : > { %1304 = vrot.lane.b32.xlu1 %v1273_v17, %s1527_s18 }
 0x151   : > { %1309 = vrot.lane.b32.xlu2 %v1263_v12, %s1528_s19 }
 0x153   : > { %1314 = vrot.lane.b32.xlu0 %v1268_v14, %s1528_s19 }
 0x157   : > { %1319 = vrot.lane.b32.xlu1 %v1273_v17, %s1528_s19 }
 0x159   : > { %507 = vrot.lane.b32.xlu2 %v493_v22, %s1528_s19 }
 0x193   : > { %v1265_v23 = vpop.permute.xlu2 %1264 }
 0x194   : > { %v1267_v26 = vunpack.i.h.bf16 %v1265_v23  ;;  %v1266_v27 = vunpack.i.l.bf16 %v1265_v23 }
 0x196   : > { %v389_v39 = vsel %vm388_vm5, %v1266_v27, %v1267_v26 }
 0x197   : > { %v400_v46 = vmax.f32 %v364_v4, %v389_v39 }
 0x19b   : > { %v1280_v30 = vpop.permute.xlu2 %1279 }
 0x19c   : > { %v1282_v31 = vunpack.i.h.bf16 %v1280_v30  ;;  %v1281_v32 = vunpack.i.l.bf16 %v1280_v30 }
 0x19e   : > { %v428_v42 = vsel %vm427_vm6, %v1281_v32, %v1282_v31 }
 0x19f   : > { %v439_v52 = vmax.f32 %v400_v46, %v428_v42 }
 0x1a3   : > { %v1295_v24 = vpop.permute.xlu2 %1294 }
 0x1a4   : > { %v1297_v40 = vunpack.i.h.bf16 %v1295_v24  ;;  %v1296_v41 = vunpack.i.l.bf16 %v1295_v24 }
 0x1a6   : > { %v467_v49 = vsel %vm466_vm7, %v1296_v41, %v1297_v40 }
 0x1a7   : > { %v478_v55 = vmax.f32 %v439_v52, %v467_v49 }
 0x1ab   : > { %v1310_v35 = vpop.permute.xlu2 %1309 }
 0x1ac   : > { %v1312_v43 = vunpack.i.h.bf16 %v1310_v35  ;;  %v1311_v44 = vunpack.i.l.bf16 %v1310_v35 }
 0x1ad   : > { %v1270_v1 = vpop.permute.xlu0 %1269 }
 0x1ae   : > { %v1271_v45 = vunpack.i.l.bf16 %v1270_v1  ;;  %v1272_v47 = vunpack.i.h.bf16 %v1270_v1  ;;  %v510_v28 = vsel %vm509_vm8, %v1311_v44, %v1312_v43 }
 0x1af   : > { %v522_v61 = vmax.f32 %v478_v55, %v510_v28 }
 0x1b0   : > { %v390_v29 = vsel %vm388_vm5, %v1267_v26, %v1271_v45  ;;  %v391_v56 = vsel %vm388_vm5, %v1271_v45, %v1272_v47 }
 0x1b1   : > { %v1275_v25 = vpop.permute.xlu1 %1274  ;;  %v401_v63 = vmax.f32 %v365_v6, %v390_v29  ;;  %v402_v8 = vmax.f32 %v366_v9, %v391_v56 }
 0x1b2   : > { %v1276_v50 = vunpack.i.l.bf16 %v1275_v25  ;;  %v1277_v53 = vunpack.i.h.bf16 %v1275_v25 }
 0x1b3   : > { %v508_v27 = vpop.permute.xlu2 %507 }
 0x1b4   : > { %v392_v58 = vsel %vm388_vm5, %v1272_v47, %v1276_v50  ;;  %v393_v0 = vsel %vm388_vm5, %v1276_v50, %v1277_v53  ;;  %v405_v11 = vmax.f32 %v369_v16, %v1277_v53 }
 0x1b5   : > { %v1285_v5 = vpop.permute.xlu0 %1284  ;;  %v403_v12 = vmax.f32 %v367_v10, %v392_v58  ;;  %v404_v20 = vmax.f32 %v368_v15, %v393_v0 }
 0x1b6   : > { %v1286_v51 = vunpack.i.l.bf16 %v1285_v5  ;;  %v1287_v54 = vunpack.i.h.bf16 %v1285_v5 }
 0x1b8   : > { %v429_v59 = vsel %vm427_vm6, %v1282_v31, %v1286_v51  ;;  %v430_v3 = vsel %vm427_vm6, %v1286_v51, %v1287_v54 }
 0x1b9   : > { %v1290_v38 = vpop.permute.xlu1 %1289  ;;  %v440_v62 = vmax.f32 %v401_v63, %v429_v59  ;;  %v441_v21 = vmax.f32 %v402_v8, %v430_v3 }
 0x1ba   : > { %v1292_v34 = vunpack.i.h.bf16 %v1290_v38  ;;  %v1291_v60 = vunpack.i.l.bf16 %v1290_v38 }
 0x1bc   : > { %v431_v14 = vsel %vm427_vm6, %v1287_v54, %v1291_v60  ;;  %v432_v17 = vsel %vm427_vm6, %v1291_v60, %v1292_v34  ;;  %v444_v23 = vmax.f32 %v405_v11, %v1292_v34 }
 0x1bd   : > { %v1300_v48 = vpop.permute.xlu0 %1299  ;;  %v442_v30 = vmax.f32 %v403_v12, %v431_v14  ;;  %v443_v1 = vmax.f32 %v404_v20, %v432_v17 }
 0x1be   : > { %v1301_v33 = vunpack.i.l.bf16 %v1300_v48  ;;  %v1302_v2 = vunpack.i.h.bf16 %v1300_v48 }
 0x1c0   : > { %v468_v4 = vsel %vm466_vm7, %v1297_v40, %v1301_v33  ;;  %v469_v9 = vsel %vm466_vm7, %v1301_v33, %v1302_v2 }
 0x1c1   : > { %v1305_v57 = vpop.permute.xlu1 %1304  ;;  %v479_v22 = vmax.f32 %v440_v62, %v468_v4  ;;  %v480_v26 = vmax.f32 %v441_v21, %v469_v9 }
 0x1c2   : > { %v1307_v37 = vunpack.i.h.bf16 %v1305_v57  ;;  %v1306_v7 = vunpack.i.l.bf16 %v1305_v57 }
 0x1c4   : > { %v470_v16 = vsel %vm466_vm7, %v1302_v2, %v1306_v7  ;;  %v471_v36 = vsel %vm466_vm7, %v1306_v7, %v1307_v37  ;;  %v483_v35 = vmax.f32 %v444_v23, %v1307_v37 }
 0x1c5   : > { %v1315_v6 = vpop.permute.xlu0 %1314  ;;  %v481_v31 = vmax.f32 %v442_v30, %v470_v16  ;;  %v482_v32 = vmax.f32 %v443_v1, %v471_v36 }
 0x1c6   : > { %v1317_v18 = vunpack.i.h.bf16 %v1315_v6  ;;  %v1316_v19 = vunpack.i.l.bf16 %v1315_v6 }
 0x1c8   : > { %v511_v10 = vsel %vm509_vm8, %v1312_v43, %v1316_v19  ;;  %v512_v24 = vsel %vm509_vm8, %v1316_v19, %v1317_v18 }
 0x1c9   : > { %v523_v25 = vmax.f32 %v479_v22, %v511_v10  ;;  %v1320_v5 = vpop.permute.xlu1 %1319  ;;  %v524_v39 = vmax.f32 %v480_v26, %v512_v24 }
 0x1ca   : > { %v1322_v13 = vunpack.i.h.bf16 %v1320_v5  ;;  %v1321_v15 = vunpack.i.l.bf16 %v1320_v5 }
 0x1cb   : > { %v1706_v38 = vpack.c.bf16 %v523_v25, %v522_v61 }
 0x1cc   : > { %v513_v40 = vsel %vm509_vm8, %v1317_v18, %v1321_v15  ;;  %v514_v41 = vsel %vm509_vm8, %v1321_v15, %v1322_v13  ;;  %v515_v42 = vsel %vm509_vm8, %v1322_v13, %v508_v27 }
 0x1cd   : > { %v531_v43 = vunpack.c.l.bf16 %v1706_v38  ;;  %v532_v44 = vunpack.c.h.bf16 %v1706_v38  ;;  %v525_v45 = vmax.f32 %v481_v31, %v513_v40  ;;  %v526_v46 = vmax.f32 %v482_v32, %v514_v41 }
 0x1ce   : > { %v527_v47 = vmax.f32 %v483_v35, %v515_v42 }
 0x1cf   : > { %v1713_v48 = vpack.c.bf16 %v525_v45, %v524_v39  ;;  %v1323_v49 = vpack.i.bf16 %v532_v44, %v531_v43 }
 0x1d0   : > { %v1719_v50 = vpack.c.bf16 %v527_v47, %v526_v46 }
 0x1d1   : > { %v533_v51 = vunpack.c.l.bf16 %v1713_v48  ;;  %v534_v52 = vunpack.c.h.bf16 %v1713_v48  ;;  %1324 = vrot.lane.b32.xlu0 %v1323_v49, %s1521_s12 }
 0x1d2   : > { %v535_v53 = vunpack.c.l.bf16 %v1719_v50  ;;  %v536_v28 = vunpack.c.h.bf16 %v1719_v50 }
 0x1d3   : > { %v1328_v29 = vpack.i.bf16 %v534_v52, %v533_v51 }
 0x1d4   : > { %v1333_v54 = vpack.i.bf16 %v536_v28, %v535_v53 }
 0x1d5   : > { %1329 = vrot.lane.b32.xlu1 %v1328_v29, %s1521_s12 }
 0x1d6   : > { %1334 = vrot.lane.b32.xlu2 %v1333_v54, %s1521_s12 }
 0x1d9   : > { %1339 = vrot.lane.b32.xlu0 %v1323_v49, %s1522_s13 }
 0x1dd   : > { %1344 = vrot.lane.b32.xlu1 %v1328_v29, %s1522_s13 }
 0x1de   : > { %1349 = vrot.lane.b32.xlu2 %v1333_v54, %s1522_s13 }
 0x1e1   : > { %1354 = vrot.lane.b32.xlu0 %v1323_v49, %s1523_s14 }
 0x1e5   : > { %1359 = vrot.lane.b32.xlu1 %v1328_v29, %s1523_s14 }
 0x1e6   : > { %1364 = vrot.lane.b32.xlu2 %v1333_v54, %s1523_s14 }
 0x1e9   : > { %1369 = vrot.lane.b32.xlu0 %v1323_v49, %s1524_s15 }
 0x1ed   : > { %1374 = vrot.lane.b32.xlu1 %v1328_v29, %s1524_s15 }
 0x1ee   : > { %1379 = vrot.lane.b32.xlu2 %v1333_v54, %s1524_s15 }
 0x230   : > { %v1335_v33 = vpop.permute.xlu2 %1334 }
 0x231   : > { %v1337_v56 = vunpack.i.h.bf16 %v1335_v33  ;;  %v1336_v57 = vunpack.i.l.bf16 %v1335_v33 }
 0x233   : > { %v559_v60 = vsel %vm141_vm1, %v1336_v57, %v1337_v56  ;;  %v571_v3 = vmax.f32 %v536_v28, %v1337_v56 }
 0x234   : > { %v570_v4 = vmax.f32 %v535_v53, %v559_v60 }
 0x238   : > { %v1350_v55 = vpop.permute.xlu2 %1349 }
 0x239   : > { %v1352_v59 = vunpack.i.h.bf16 %v1350_v55  ;;  %v1351_v34 = vunpack.i.l.bf16 %v1350_v55 }
 0x23b   : > { %v597_v2 = vsel %vm219_vm2, %v1351_v34, %v1352_v59  ;;  %v609_v11 = vmax.f32 %v571_v3, %v1352_v59 }
 0x23c   : > { %v608_v8 = vmax.f32 %v570_v4, %v597_v2 }
 0x240   : > { %v1365_v58 = vpop.permute.xlu2 %1364 }
 0x241   : > { %v1367_v61 = vunpack.i.h.bf16 %v1365_v58  ;;  %v1366_v63 = vunpack.i.l.bf16 %v1365_v58 }
 0x243   : > { %v1325_v0 = vpop.permute.xlu0 %1324  ;;  %v635_v37 = vsel %vm279_vm3, %v1366_v63, %v1367_v61  ;;  %v647_v17 = vmax.f32 %v609_v11, %v1367_v61 }
 0x244   : > { %v646_v14 = vmax.f32 %v608_v8, %v635_v37  ;;  %v1327_v36 = vunpack.i.h.bf16 %v1325_v0  ;;  %v1326_v10 = vunpack.i.l.bf16 %v1325_v0 }
 0x246   : > { %v555_v15 = vsel %vm141_vm1, %v1326_v10, %v1327_v36 }
 0x247   : > { %v1330_v7 = vpop.permute.xlu1 %1329  ;;  %v566_v29 = vmax.f32 %v531_v43, %v555_v15 }
 0x248   : > { %v1744_v12 = vpop.permute.xlu2 %1379  ;;  %v1332_v30 = vunpack.i.h.bf16 %v1330_v7  ;;  %v1331_v1 = vunpack.i.l.bf16 %v1330_v7 }
 0x249   : > { %v1382_v62 = vunpack.i.h.bf16 %v1744_v12  ;;  %v1381_v6 = vunpack.i.l.bf16 %v1744_v12 }
 0x24a   : > { %v556_v27 = vsel %vm141_vm1, %v1327_v36, %v1331_v1  ;;  %v557_v31 = vsel %vm141_vm1, %v1331_v1, %v1332_v30  ;;  %v558_v32 = vsel %vm141_vm1, %v1332_v30, %v1336_v57 }
 0x24b   : > { %v673_v18 = vsel %vm339_vm4, %v1381_v6, %v1382_v62  ;;  %v1340_v19 = vpop.permute.xlu0 %1339  ;;  %v685_v21 = vmax.f32 %v647_v17, %v1382_v62  ;;  %v567_v54 = vmax.f32 %v532_v44, %v556_v27  ;;  %v568_v33 = vmax.f32 %v533_v51, %v557_v31 }
 0x24c   : > { %v684_v20 = vmax.f32 %v646_v14, %v673_v18  ;;  %v1342_v24 = vunpack.i.h.bf16 %v1340_v19  ;;  %v1341_v25 = vunpack.i.l.bf16 %v1340_v19  ;;  %v569_v55 = vmax.f32 %v534_v52, %v558_v32 }
 0x24e   : > { %v688_v9 = vpack.c.bf16 %v685_v21, %v684_v20  ;;  %v593_v42 = vsel %vm219_vm2, %v1341_v25, %v1342_v24 }
 0x24f   : > { %v1345_v22 = vpop.permute.xlu1 %1344 }
 0x250   : > { %v1749_v23 = vunpack.c.l.bf16 %v688_v9  ;;  %v1346_v5 = vunpack.i.l.bf16 %v1345_v22  ;;  %v1347_v13 = vunpack.i.h.bf16 %v1345_v22 }
 0x252   : > { %707 = vrot.lane.b32.xlu2 %v1749_v23, %s1525_s16  ;;  %v594_v45 = vsel %vm219_vm2, %v1342_v24, %v1346_v5  ;;  %v595_v47 = vsel %vm219_vm2, %v1346_v5, %v1347_v13  ;;  %v596_v49 = vsel %vm219_vm2, %v1347_v13, %v1351_v34  ;;  %v604_v34 = vmax.f32 %v566_v29, %v593_v42 }
 0x253   : > { %v1355_v16 = vpop.permute.xlu0 %1354  ;;  %v605_v60 = vmax.f32 %v567_v54, %v594_v45  ;;  %v606_v43 = vmax.f32 %v568_v33, %v595_v47  ;;  %v607_v61 = vmax.f32 %v569_v55, %v596_v49  ;;  %v1413_v3 = vpack.i.bf16 %v685_v21, %v1749_v23 }
 0x254   : > { %v1357_v35 = vunpack.i.h.bf16 %v1355_v16  ;;  %v1356_v39 = vunpack.i.l.bf16 %v1355_v16 }
 0x256   : > { %v631_v56 = vsel %vm279_vm3, %v1356_v39, %v1357_v35 }
 0x257   : > { %v1360_v26 = vpop.permute.xlu1 %1359  ;;  %v642_v52 = vmax.f32 %v604_v34, %v631_v56 }
 0x258   : > { %v1362_v40 = vunpack.i.h.bf16 %v1360_v26  ;;  %v1361_v41 = vunpack.i.l.bf16 %v1360_v26 }
 0x25a   : > { %739 = vrot.lane.b32.xlu2 %v1749_v23, %s1526_s17  ;;  %v632_v57 = vsel %vm279_vm3, %v1357_v35, %v1361_v41  ;;  %v633_v58 = vsel %vm279_vm3, %v1361_v41, %v1362_v40  ;;  %v634_v59 = vsel %vm279_vm3, %v1362_v40, %v1366_v63 }
 0x25b   : > { %v1370_v46 = vpop.permute.xlu0 %1369  ;;  %v643_v4 = vmax.f32 %v605_v60, %v632_v57  ;;  %v644_v37 = vmax.f32 %v606_v43, %v633_v58  ;;  %v645_v7 = vmax.f32 %v607_v61, %v634_v59 }
 0x25c   : > { %v1372_v53 = vunpack.i.h.bf16 %v1370_v46  ;;  %v1371_v28 = vunpack.i.l.bf16 %v1370_v46 }
 0x25e   : > { %v669_v44 = vsel %vm339_vm4, %v1371_v28, %v1372_v53 }
 0x25f   : > { %v1375_v0 = vpop.permute.xlu1 %1374  ;;  %v680_v12 = vmax.f32 %v642_v52, %v669_v44 }
 0x260   : > { %v1377_v2 = vunpack.i.h.bf16 %v1375_v0  ;;  %v1376_v51 = vunpack.i.l.bf16 %v1375_v0 }
 0x262   : > { %v670_v8 = vsel %vm339_vm4, %v1372_v53, %v1376_v51  ;;  %v671_v11 = vsel %vm339_vm4, %v1376_v51, %v1377_v2  ;;  %v672_v63 = vsel %vm339_vm4, %v1377_v2, %v1381_v6  ;;  %1414 = vrot.lane.b32.xlu2 %v1413_v3, %s1527_s18 }
 0x263   : > { %v681_v62 = vmax.f32 %v643_v4, %v670_v8  ;;  %v682_v14 = vmax.f32 %v644_v37, %v671_v11  ;;  %v683_v17 = vmax.f32 %v645_v7, %v672_v63 }
 0x265   : > { %v1781_v18 = vpack.c.bf16 %v681_v62, %v680_v12  ;;  %v1783_v19 = vpack.c.bf16 %v683_v17, %v682_v14 }
 0x267   : > { %v689_v20 = vunpack.c.l.bf16 %v1781_v18  ;;  %v690_v21 = vunpack.c.h.bf16 %v1781_v18  ;;  %v691_v9 = vunpack.c.l.bf16 %v1783_v19  ;;  %v692_v22 = vunpack.c.h.bf16 %v1783_v19 }
 0x269   : > { %v1388_v16 = vpack.i.bf16 %v692_v22, %v691_v9  ;;  %v1383_v6 = vpack.i.bf16 %v690_v21, %v689_v20 }
 0x26a   : > { %1429 = vrot.lane.b32.xlu2 %v1413_v3, %s1528_s19 }
 0x26b   : > { %1389 = vrot.lane.b32.xlu1 %v1388_v16, %s1525_s16  ;;  %1384 = vrot.lane.b32.xlu0 %v1383_v6, %s1525_s16 }
 0x273   : > { %1399 = vrot.lane.b32.xlu1 %v1388_v16, %s1526_s17  ;;  %1394 = vrot.lane.b32.xlu0 %v1383_v6, %s1526_s17 }
 0x27b   : > { %1409 = vrot.lane.b32.xlu1 %v1388_v16, %s1527_s18  ;;  %1404 = vrot.lane.b32.xlu0 %v1383_v6, %s1527_s18 }
 0x283   : > { %1424 = vrot.lane.b32.xlu1 %v1388_v16, %s1528_s19  ;;  %1419 = vrot.lane.b32.xlu0 %v1383_v6, %s1528_s19 }
 0x2ac   : > { %v708_v36 = vpop.permute.xlu2 %707 }
 0x2ad   : > { %v722_v25 = vmax.f32 %v1749_v23, %v708_v36 }
 0x2b4   : > { %v740_v10 = vpop.permute.xlu2 %739 }
 0x2b5   : > { %v754_v26 = vmax.f32 %v722_v25, %v740_v10 }
 0x2bc   : > { %v1415_v30 = vpop.permute.xlu2 %1414 }
 0x2bd   : > { %v1417_v1 = vunpack.i.h.bf16 %v1415_v30  ;;  %v1416_v24 = vunpack.i.l.bf16 %v1415_v30 }
 0x2bf   : > { %v781_v5 = vsel %vm466_vm7, %v1416_v24, %v1417_v1 }
 0x2c0   : > { %v791_v31 = vmax.f32 %v754_v26, %v781_v5 }
 0x2c4   : > { %v1804_v13 = vpop.permute.xlu2 %1429 }
 0x2c5   : > { %v1432_v15 = vunpack.i.h.bf16 %v1804_v13  ;;  %v1431_v27 = vunpack.i.l.bf16 %v1804_v13 }
 0x2c7   : > { %v816_v32 = vsel %vm509_vm8, %v1431_v27, %v1432_v15 }
 0x2c8   : > { %v826_v35 = vmax.f32 %v791_v31, %v816_v32 }
 0x2ca   : > { %v829_v39 = vpack.c.bf16 %v826_v35, %v826_v35 }
 0x2cc   : > { %v1809_v40 = vunpack.c.l.bf16 %v829_v39 }
 0x2ce   : > { %848 = vrot.lane.b32.xlu2 %v1809_v40, %s1521_s12 }
 0x2d6   : > { %880 = vrot.lane.b32.xlu2 %v1809_v40, %s1522_s13 }
 0x2dd   : > { %v1390_v23 = vpop.permute.xlu1 %1389  ;;  %v1385_v41 = vpop.permute.xlu0 %1384 }
 0x2de   : > { %912 = vrot.lane.b32.xlu2 %v1809_v40, %s1523_s14  ;;  %v1392_v46 = vunpack.i.h.bf16 %v1390_v23  ;;  %v1391_v47 = vunpack.i.l.bf16 %v1390_v23  ;;  %v1387_v49 = vunpack.i.h.bf16 %v1385_v41  ;;  %v1386_v53 = vunpack.i.l.bf16 %v1385_v41 }
 0x2e0   : > { %v712_v57 = vsel %vm388_vm5, %v1392_v46, %v708_v36  ;;  %v711_v58 = vsel %vm388_vm5, %v1391_v47, %v1392_v46  ;;  %v710_v59 = vsel %vm388_vm5, %v1387_v49, %v1391_v47  ;;  %v709_v34 = vsel %vm388_vm5, %v1386_v53, %v1387_v49 }
 0x2e1   : > { %v721_v3 = vmax.f32 %v692_v22, %v712_v57  ;;  %v720_v52 = vmax.f32 %v691_v9, %v711_v58  ;;  %v719_v4 = vmax.f32 %v690_v21, %v710_v59  ;;  %v718_v37 = vmax.f32 %v689_v20, %v709_v34 }
 0x2e5   : > { %v1400_v42 = vpop.permute.xlu1 %1399  ;;  %v1395_v45 = vpop.permute.xlu0 %1394 }
 0x2e6   : > { %944 = vrot.lane.b32.xlu2 %v1809_v40, %s1524_s15  ;;  %v1402_v54 = vunpack.i.h.bf16 %v1400_v42  ;;  %v1401_v33 = vunpack.i.l.bf16 %v1400_v42  ;;  %v1397_v55 = vunpack.i.h.bf16 %v1395_v45  ;;  %v1396_v56 = vunpack.i.l.bf16 %v1395_v45 }
 0x2e8   : > { %v744_v44 = vsel %vm427_vm6, %v1402_v54, %v740_v10  ;;  %v743_v2 = vsel %vm427_vm6, %v1401_v33, %v1402_v54  ;;  %v742_v51 = vsel %vm427_vm6, %v1397_v55, %v1401_v33 }
 0x2e9   : > { %v752_v12 = vmax.f32 %v720_v52, %v743_v2  ;;  %v753_v62 = vmax.f32 %v721_v3, %v744_v44  ;;  %v751_v17 = vmax.f32 %v719_v4, %v742_v51 }
 0x2ed   : > { %v1410_v28 = vpop.permute.xlu1 %1409  ;;  %v1405_v29 = vpop.permute.xlu0 %1404 }
 0x2ee   : > { %1080 = vrot.lane.b32.xlu2 %v1713_v48, %s1529_s20  ;;  %v1412_v60 = vunpack.i.h.bf16 %v1410_v28  ;;  %v1411_v43 = vunpack.i.l.bf16 %v1410_v28  ;;  %v1407_v61 = vunpack.i.h.bf16 %v1405_v29  ;;  %v1406_v0 = vunpack.i.l.bf16 %v1405_v29 }
 0x2ef   : > { %v741_v48 = vsel %vm427_vm6, %v1396_v56, %v1397_v55 }
 0x2f0   : > { %v780_v7 = vsel %vm466_vm7, %v1412_v60, %v1416_v24  ;;  %v779_v8 = vsel %vm466_vm7, %v1411_v43, %v1412_v60  ;;  %v778_v11 = vsel %vm466_vm7, %v1407_v61, %v1411_v43  ;;  %v777_v63 = vsel %vm466_vm7, %v1406_v0, %v1407_v61 }
 0x2f1   : > { %v750_v14 = vmax.f32 %v718_v37, %v741_v48  ;;  %v789_v18 = vmax.f32 %v752_v12, %v779_v8  ;;  %v790_v20 = vmax.f32 %v753_v62, %v780_v7  ;;  %v788_v10 = vmax.f32 %v751_v17, %v778_v11 }
 0x2f3   : > { %v787_v36 = vmax.f32 %v750_v14, %v777_v63 }
 0x2f5   : > { %v1425_v19 = vpop.permute.xlu1 %1424  ;;  %v1420_v9 = vpop.permute.xlu0 %1419 }
 0x2f6   : > { %v1427_v22 = vunpack.i.h.bf16 %v1425_v19  ;;  %v1426_v16 = vunpack.i.l.bf16 %v1425_v19  ;;  %v1422_v21 = vunpack.i.h.bf16 %v1420_v9  ;;  %v1421_v6 = vunpack.i.l.bf16 %v1420_v9 }
 0x2f8   : > { %v815_v30 = vsel %vm509_vm8, %v1427_v22, %v1431_v27  ;;  %v814_v1 = vsel %vm509_vm8, %v1426_v16, %v1427_v22  ;;  %v813_v24 = vsel %vm509_vm8, %v1422_v21, %v1426_v16  ;;  %v812_v25 = vsel %vm509_vm8, %v1421_v6, %v1422_v21 }
 0x2f9   : > { %v824_v5 = vmax.f32 %v789_v18, %v814_v1  ;;  %v825_v26 = vmax.f32 %v790_v20, %v815_v30  ;;  %v822_v13 = vmax.f32 %v787_v36, %v812_v25  ;;  %v823_v15 = vmax.f32 %v788_v10, %v813_v24 }
 0x2fb   : > { %v1841_v31 = vpack.c.bf16 %v825_v26, %v824_v5  ;;  %v1843_v32 = vpack.c.bf16 %v823_v15, %v822_v13 }
 0x2fd   : > { %v832_v35 = vunpack.c.l.bf16 %v1841_v31  ;;  %v833_v39 = vunpack.c.h.bf16 %v1841_v31  ;;  %v830_v27 = vunpack.c.l.bf16 %v1843_v32  ;;  %v831_v23 = vunpack.c.h.bf16 %v1843_v32 }
 0x2ff   : > { %v1438_v41 = vpack.i.bf16 %v833_v39, %v832_v35  ;;  %v1433_v42 = vpack.i.bf16 %v831_v23, %v830_v27 }
 0x301   : > { %1439 = vrot.lane.b32.xlu1 %v1438_v41, %s1521_s12  ;;  %1434 = vrot.lane.b32.xlu0 %v1433_v42, %s1521_s12 }
 0x309   : > { %1449 = vrot.lane.b32.xlu1 %v1438_v41, %s1522_s13  ;;  %1444 = vrot.lane.b32.xlu0 %v1433_v42, %s1522_s13 }
 0x311   : > { %1459 = vrot.lane.b32.xlu1 %v1438_v41, %s1523_s14  ;;  %1454 = vrot.lane.b32.xlu0 %v1433_v42, %s1523_s14 }
 0x319   : > { %1469 = vrot.lane.b32.xlu1 %v1438_v41, %s1524_s15  ;;  %1464 = vrot.lane.b32.xlu0 %v1433_v42, %s1524_s15 }
 0x321   : > { %1078 = vrot.lane.b32.xlu1 %v1706_v38, %s1529_s20 }
 0x328   : > { %v849_v45 = vpop.permute.xlu2 %848 }
 0x329   : > { %v863_v49 = vmax.f32 %v1809_v40, %v849_v45 }
 0x330   : > { %v881_v46 = vpop.permute.xlu2 %880 }
 0x331   : > { %v895_v53 = vmax.f32 %v863_v49, %v881_v46 }
 0x338   : > { %v913_v47 = vpop.permute.xlu2 %912 }
 0x339   : > { %v927_v28 = vmax.f32 %v895_v53, %v913_v47 }
 0x340   : > { %v945_v29 = vpop.permute.xlu2 %944 }
 0x341   : > { %v959_v54 = vmax.f32 %v927_v28, %v945_v29 }
 0x343   : > { %v962_v33 = vpack.c.bf16 %v959_v54, %v959_v54 }
 0x345   : > { %v1021_v55 = vunpack.c.l.bf16 %v962_v33 }
 0x347   : > { %1031 = vrot.lane.b32.xlu0 %v1021_v55, %s1527_s18 }
 0x348   : > { %v1878_v28 = vpop.permute.xlu2 %1080 }
 0x34f   : > { %1059 = vrot.lane.b32.xlu0 %v1021_v55, %s1528_s19 }
 0x373   : > { %v1440_v56 = vpop.permute.xlu1 %1439  ;;  %v1435_v57 = vpop.permute.xlu0 %1434 }
 0x374   : > { %v1442_v38 = vunpack.i.h.bf16 %v1440_v56  ;;  %v1441_v34 = vunpack.i.l.bf16 %v1440_v56  ;;  %v1437_v60 = vunpack.i.h.bf16 %v1435_v57  ;;  %v1436_v43 = vunpack.i.l.bf16 %v1435_v57 }
 0x376   : > { %v853_v48 = vsel %vm141_vm1, %v1442_v38, %v849_v45  ;;  %v852_v3 = vsel %vm141_vm1, %v1441_v34, %v1442_v38  ;;  %v851_v52 = vsel %vm141_vm1, %v1437_v60, %v1441_v34  ;;  %v850_v4 = vsel %vm141_vm1, %v1436_v43, %v1437_v60  ;;  %vm1098_vm1 = vmor %vm1097_vm15, %vm1096_vm14 }
 0x377   : > { %v862_v17 = vmax.f32 %v833_v39, %v853_v48  ;;  %v861_v19 = vmax.f32 %v832_v35, %v852_v3  ;;  %v860_v9 = vmax.f32 %v831_v23, %v851_v52  ;;  %v859_v22 = vmax.f32 %v830_v27, %v850_v4 }
 0x37b   : > { %v1450_v58 = vpop.permute.xlu1 %1449  ;;  %v1445_v59 = vpop.permute.xlu0 %1444 }
 0x37c   : > { %v1452_v0 = vunpack.i.h.bf16 %v1450_v58  ;;  %v1451_v44 = vunpack.i.l.bf16 %v1450_v58  ;;  %v1447_v2 = vunpack.i.h.bf16 %v1445_v59  ;;  %v1446_v51 = vunpack.i.l.bf16 %v1445_v59 }
 0x37d   : > { %v1085_v59 = vrot.slane %v1878_v28, 4 }
 0x37e   : > { %v885_v63 = vsel %vm219_vm2, %v1452_v0, %v881_v46  ;;  %v884_v12 = vsel %vm219_vm2, %v1451_v44, %v1452_v0  ;;  %v883_v62 = vsel %vm219_vm2, %v1447_v2, %v1451_v44  ;;  %v882_v14 = vsel %vm219_vm2, %v1446_v51, %v1447_v2 }
 0x37f   : > { %v893_v20 = vmax.f32 %v861_v19, %v884_v12  ;;  %v894_v36 = vmax.f32 %v862_v17, %v885_v63  ;;  %v891_v10 = vmax.f32 %v859_v22, %v882_v14  ;;  %v892_v30 = vmax.f32 %v860_v9, %v883_v62 }
 0x380   : > { %v1103_v0 = vrot.slane %v1841_v31, 6 }
 0x383   : > { %v1460_v61 = vpop.permute.xlu1 %1459  ;;  %v1455_v40 = vpop.permute.xlu0 %1454 }
 0x384   : > { %v1462_v37 = vunpack.i.h.bf16 %v1460_v61  ;;  %v1461_v7 = vunpack.i.l.bf16 %v1460_v61  ;;  %v1457_v8 = vunpack.i.h.bf16 %v1455_v40  ;;  %v1456_v11 = vunpack.i.l.bf16 %v1455_v40 }
 0x385   : > { %v1102_v40 = vrot.slane %v1843_v32, 6 }
 0x386   : > { %v917_v16 = vsel %vm279_vm3, %v1462_v37, %v913_v47  ;;  %v916_v21 = vsel %vm279_vm3, %v1461_v7, %v1462_v37  ;;  %v915_v6 = vsel %vm279_vm3, %v1457_v8, %v1461_v7  ;;  %v914_v18 = vsel %vm279_vm3, %v1456_v11, %v1457_v8 }
 0x387   : > { %v925_v15 = vmax.f32 %v893_v20, %v916_v21  ;;  %v926_v35 = vmax.f32 %v894_v36, %v917_v16  ;;  %v923_v39 = vmax.f32 %v891_v10, %v914_v18  ;;  %v924_v27 = vmax.f32 %v892_v30, %v915_v6 }
 0x38b   : > { %v1470_v1 = vpop.permute.xlu1 %1469  ;;  %v1465_v24 = vpop.permute.xlu0 %1464 }
 0x38c   : > { %v1472_v25 = vunpack.i.h.bf16 %v1470_v1  ;;  %v1471_v5 = vunpack.i.l.bf16 %v1470_v1  ;;  %v1467_v26 = vunpack.i.h.bf16 %v1465_v24  ;;  %v1466_v13 = vunpack.i.l.bf16 %v1465_v24 }
 0x38e   : > { %v949_v23 = vsel %vm339_vm4, %v1472_v25, %v945_v29  ;;  %v948_v41 = vsel %vm339_vm4, %v1471_v5, %v1472_v25  ;;  %v947_v42 = vsel %vm339_vm4, %v1467_v26, %v1471_v5  ;;  %v946_v45 = vsel %vm339_vm4, %v1466_v13, %v1467_v26 }
 0x38f   : > { %v957_v46 = vmax.f32 %v925_v15, %v948_v41  ;;  %v958_v47 = vmax.f32 %v926_v35, %v949_v23  ;;  %v955_v49 = vmax.f32 %v923_v39, %v946_v45  ;;  %v956_v53 = vmax.f32 %v924_v27, %v947_v42 }
 0x391   : > { %v1880_v54 = vpack.c.bf16 %v958_v47, %v957_v46  ;;  %v1882_v33 = vpack.c.bf16 %v956_v53, %v955_v49 }
 0x393   : > { %v965_v55 = vunpack.c.l.bf16 %v1880_v54  ;;  %v966_v29 = vunpack.c.h.bf16 %v1880_v54  ;;  %v963_v56 = vunpack.c.l.bf16 %v1882_v33  ;;  %v964_v57 = vunpack.c.h.bf16 %v1882_v33  ;;  %v1079_v58 = vpop.permute.xlu1 %1078 }
 0x394   : > { %v1084_v38 = vrot.slane %v1079_v58, 4 }
 0x395   : > { %v1478_v34 = vpack.i.bf16 %v966_v29, %v965_v55  ;;  %v1483_v60 = vpack.i.bf16 %v964_v57, %v963_v56 }
 0x396   : > { %v1088_v43 = vsel %vm139_vm0, %v1084_v38, %v1085_v59 }
 0x397   : > { %v1090_v61 = vsel %vm1089_vm9, %v1079_v58, %v1088_v43  ;;  %1479 = vrot.lane.b32.xlu1 %v1478_v34, %s1525_s16  ;;  %1484 = vrot.lane.b32.xlu2 %v1483_v60, %s1526_s17 }
 0x398   : > { %1095 = vst [vmem:[%s1893_s24] sm:$0x33] %v1090_v61  ;;  %1474 = vrot.lane.b32.xlu0 %v1483_v60, %s1525_s16 }
 0x39f   : > { %1494 = vrot.lane.b32.xlu1 %v1483_v60, %s1527_s18  ;;  %1499 = vrot.lane.b32.xlu2 %v1478_v34, %s1527_s18 }
 0x3a0   : > { %1489 = vrot.lane.b32.xlu0 %v1478_v34, %s1526_s17 }
 0x3a7   : > { %1504 = vrot.lane.b32.xlu1 %v1483_v60, %s1528_s19  ;;  %1509 = vrot.lane.b32.xlu2 %v1478_v34, %s1528_s19 }
 0x3a8   : > { %1082 = vrot.lane.b32.xlu0 %v1719_v50, %s1529_s20 }
 0x3af   : > { %1104 = vrot.lane.b32.xlu1 %v1102_v40, %s1530_s25  ;;  %1106 = vrot.lane.b32.xlu2 %v1103_v0, %s1530_s25 }
 0x3b9   : > { %v1032_v2 = vpop.permute.xlu0 %1031 }
 0x3c1   : > { %v1060_v3 = vpop.permute.xlu0 %1059 }
 0x3f1   : > { %v1485_v44 = vpop.permute.xlu2 %1484 }
 0x3f2   : > { %v1487_v63 = vunpack.i.h.bf16 %v1485_v44  ;;  %v1486_v12 = vunpack.i.l.bf16 %v1485_v44 }
 0x3f4   : > { %v1004_v15 = vsel %vm427_vm6, %v1486_v12, %v1487_v63 }
 0x3f9   : > { %v1500_v51 = vpop.permute.xlu2 %1499 }
 0x3fa   : > { %v1502_v19 = vunpack.i.h.bf16 %v1500_v51  ;;  %v1501_v9 = vunpack.i.l.bf16 %v1500_v51 }
 0x3fc   : > { %v1036_v35 = vsel %vm466_vm7, %v1502_v19, %v1032_v2  ;;  %v1035_v27 = vsel %vm466_vm7, %v1501_v9, %v1502_v19 }
 0x401   : > { %v1914_v48 = vpop.permute.xlu2 %1509 }
 0x402   : > { %v1512_v22 = vunpack.i.h.bf16 %v1914_v48  ;;  %v1511_v6 = vunpack.i.l.bf16 %v1914_v48 }
 0x404   : > { %v1064_v42 = vsel %vm509_vm8, %v1512_v22, %v1060_v3  ;;  %v1063_v47 = vsel %vm509_vm8, %v1511_v6, %v1512_v22 }
 0x409   : > { %v1480_v52 = vpop.permute.xlu1 %1479  ;;  %v1916_v4 = vpop.permute.xlu2 %1106 }
 0x40a   : > { %v1109_v50 = vrot.slane %v1916_v4, 4  ;;  %v1475_v31 = vpop.permute.xlu0 %1474  ;;  %v1482_v37 = vunpack.i.h.bf16 %v1480_v52  ;;  %v1481_v7 = vunpack.i.l.bf16 %v1480_v52 }
 0x40b   : > { %v1477_v8 = vunpack.i.h.bf16 %v1475_v31  ;;  %v1476_v11 = vunpack.i.l.bf16 %v1475_v31 }
 0x40c   : > { %v1113_v32 = vsel %vm1111_vm12, %v1916_v4, %v1109_v50  ;;  %v981_v62 = vsel %vm388_vm5, %v1481_v7, %v1482_v37  ;;  %v989_v18 = vmax.f32 %v966_v29, %v1482_v37 }
 0x40d   : > { %1120 = vst.msk [vmem:[%s1893_s24 + $0x8] sm:$0xcc] %vm1119_vm13, %v1113_v32  ;;  %v980_v14 = vsel %vm388_vm5, %v1477_v8, %v1481_v7  ;;  %v979_v16 = vsel %vm388_vm5, %v1476_v11, %v1477_v8  ;;  %v988_v10 = vmax.f32 %v965_v55, %v981_v62 }
 0x40e   : > { %v987_v30 = vmax.f32 %v964_v57, %v980_v14  ;;  %v986_v25 = vmax.f32 %v963_v56, %v979_v16 }
 0x410   : > { %v1011_v49 = vmax.f32 %v986_v25, %v1004_v15 }
 0x411   : > { %v1495_v17 = vpop.permute.xlu1 %1494 }
 0x412   : > { %v1490_v21 = vpop.permute.xlu0 %1489  ;;  %v1497_v1 = vunpack.i.h.bf16 %v1495_v17  ;;  %v1496_v24 = vunpack.i.l.bf16 %v1495_v17 }
 0x413   : > { %v1492_v20 = vunpack.i.h.bf16 %v1490_v21  ;;  %v1491_v36 = vunpack.i.l.bf16 %v1490_v21 }
 0x414   : > { %v1033_v45 = vsel %vm466_vm7, %v1496_v24, %v1497_v1  ;;  %v1034_v33 = vsel %vm466_vm7, %v1497_v1, %v1501_v9 }
 0x415   : > { %v1014_v5 = vmax.f32 %v989_v18, %v1492_v20  ;;  %v1005_v26 = vsel %vm427_vm6, %v1487_v63, %v1491_v36  ;;  %v1006_v13 = vsel %vm427_vm6, %v1491_v36, %v1492_v20  ;;  %v1041_v58 = vmax.f32 %v1011_v49, %v1033_v45 }
 0x416   : > { %v1013_v39 = vmax.f32 %v988_v10, %v1006_v13  ;;  %v1012_v41 = vmax.f32 %v987_v30, %v1005_v26 }
 0x417   : > { %v1044_v23 = vmax.f32 %v1014_v5, %v1036_v35 }
 0x418   : > { %v1043_v46 = vmax.f32 %v1013_v39, %v1035_v27  ;;  %v1042_v38 = vmax.f32 %v1012_v41, %v1034_v33 }
 0x419   : > { %v1072_v53 = vmax.f32 %v1044_v23, %v1064_v42  ;;  %v1505_v54 = vpop.permute.xlu1 %1504 }
 0x41a   : > { %v1071_v55 = vmax.f32 %v1043_v46, %v1063_v47  ;;  %v1507_v29 = vunpack.i.h.bf16 %v1505_v54  ;;  %v1506_v56 = vunpack.i.l.bf16 %v1505_v54  ;;  %v1083_v57 = vpop.permute.xlu0 %1082 }
 0x41b   : > { %v1086_v34 = vrot.slane %v1083_v57, 4 }
 0x41c   : > { %v1074_v60 = vpack.c.bf16 %v1072_v53, %v1071_v55  ;;  %v1061_v43 = vsel %vm509_vm8, %v1506_v56, %v1507_v29  ;;  %v1062_v61 = vsel %vm509_vm8, %v1507_v29, %v1511_v6 }
 0x41d   : > { %v1069_v40 = vmax.f32 %v1041_v58, %v1061_v43  ;;  %v1070_v0 = vmax.f32 %v1042_v38, %v1062_v61  ;;  %v1091_v44 = vsel %vm139_vm0, %v1085_v59, %v1086_v34 }
 0x41e   : > { %v1092_v2 = vsel %vm1089_vm9, %v1878_v28, %v1091_v44  ;;  %1122 = vst.msk [vmem:[%s1893_s24 + $0x18] sm:$0x33] %vm1098_vm1, %v1074_v60 }
 0x41f   : > { %v1073_v51 = vpack.c.bf16 %v1070_v0, %v1069_v40  ;;  %1099 = vst.msk [vmem:[%s1893_s24 + $0x8] sm:$0x33] %vm1098_vm1, %v1092_v2 }
 0x421   : > { %1121 = vst [vmem:[%s1893_s24 + $0x10] sm:$0x33] %v1073_v51  ;;  %v1105_v48 = vpop.permute.xlu1 %1104 }
 0x422   : > { %v1108_v3 = vrot.slane %v1105_v48, 4 }
 0x424   : > { %v1110_v52 = vsel %vm139_vm0, %v1108_v3, %v1109_v50 }
 0x425   : > { %v1112_v31 = vsel %vm1111_vm12, %v1105_v48, %v1110_v52 }
 0x426   : > { %1116 = vst [vmem:[%s1893_s24] sm:$0xcc] %v1112_v31 }
 0x427 PF: > { %s11_s6 = sadd.s32 1, %s1519_s6  }
 0x428   : > { %p8_p4 = scmp.ge.s32.totalorder %s11_s6, 4  }
 0x42a   :  { %10 = sbr.rel (!%p8_p4) target bundleno = 1 (0x1), region = 66 }

// kernel: sppfcspc_forward.12
= control target key start
LH: loop header
LB: loop body
LE: loop exit
PB: predicated region body
PF: predicated region fallthrough
CT: control target
= control target key end

     0   :  { %s642_s18 = smov 0   ;;  %s644_s19 = smov 0   ;;  %s698_s0 = inlined_call_operand.vmem [shape: bf16[2,4,256], index: 0, kind: input, shape index: {}]   ;;  %s699_s1 = inlined_call_operand.vmem [shape: bf16[2,12,256], index: 1, kind: input, shape index: {}]   ;;  %s700_s2 = inlined_call_operand.vmem [shape: bf16[4,4], index: 2, kind: input, shape index: {}]   ;;  %s701_s3 = inlined_call_operand.vmem [shape: bf16[4,12], index: 3, kind: input, shape index: {}]   ;;  %s702_s4 = inlined_call_operand.vmem [shape: f32[4,1], index: 4, kind: input, shape index: {}]   ;;  %s703_s5 = inlined_call_operand.vmem [shape: bf16[2,4,256], index: 5, kind: output, shape index: {}]  }
   0x1   :  { %s646_s20 = smov 0  }
   0x2 LB: > { %s27_s21 = sadd.s32 1, %s605_s19  ;;  %p527_p0 = scmp.ge.s32.totalorder %s609_s20, 1  ;;  %s609_s20 = sphi %s646_s20, %s15_s20   ;;  %s605_s19 = sphi %s644_s19, %s705_s19   ;;  %s601_s18 = sphi %s642_s18, %s704_s18  }
   0x3   : > { %p29_p1 = scmp.ge.s32.totalorder %s27_s21, 2  ;;  %p225_p2 = scmp.lt.s32.totalorder %s609_s20, 3 }
   0x5   : > { %s707_s21 = smov (%p29_p1, %s27_s21), 0  ;;  %p226_p3 = pnand %p527_p0, %p225_p2 }
   0x6   : > { %p271_p4 = scmp.lt.s32.totalorder (!%p226_p3), %s601_s18, 1 }
   0x7   : > { %229 = sbr.rel (%p226_p3) target bundleno = 193 (0xc1), region = 40 }
   0xc   : > { %v390_v0 = vld [vmem:[%s702_s4] sm:$0xf]  ;;  %s709_s18 = smov (!%p271_p4, %s601_s18), 1  ;;  %v611_v1 = vmov 0   ;;  %vm318_vm0 = vcmask 1045504   ;;  %vm314_vm1 = vcmask 97280  }
   0xd   : > { %578 = vset.pattern.permute.xlu0 %v611_v1  ;;  %s548_s24 = sshll.u32 %s709_s18, 2  ;;  %s549_s25 = sshll.u32 %s709_s18, 4  ;;  %v303_v11 = vld [vmem:[%s701_s3] sm:$0x3]  ;;  %vm359_vm2 = vcmask 1041408   ;;  %vm355_vm3 = vcmask 31744  }
   0xe   : > { %393 = vperm.xlu0 %578, %v390_v0   ;;  %s278_s28 = scalar_lea.vmem %s698_s0, %s548_s24  ;;  %s288_s6 = scalar_lea.vmem %s699_s1, %s549_s25  ;;  %v301_v16 = vld [vmem:[%s700_s2] sm:$0x3] }
   0xf   : > { %v302_v2 = vld [vmem:[%s278_s28] sm:$0xf]  ;;  %v552_v4 = vld [vmem:[%s288_s6 + $0x4] sm:$0x30]  ;;  %v551_v6 = vld [vmem:[%s288_s6 + $0x4] sm:$0xf]  ;;  %s298_s13 = scalar_lea.vmem %s703_s5, %s548_s24 }
  0x10   : > { %v536_v3 = vld [vmem:[%s288_s6] sm:$0xf]  ;;  %352 = vst [vmem:[#allocation1] ss:$4 sm:$0xff] %v302_v2  ;;  %v538_v7 = vld [vmem:[%s288_s6 + $0x8] sm:$0x30] }
  0x11   : > { %v537_v5 = vor.u32 %v552_v4, %v536_v3  ;;  %v541_v8 = vor.u32 %v551_v6, %v538_v7 }
  0x13   : > { %v320_v9 = vsel %vm318_vm0, %v537_v5, 0  ;;  %v323_v10 = vsel %vm318_vm0, %v541_v8, 0 }
  0x14   : > { %332 = vmatpush.bf16.msra.mxu0 %v320_v9  ;;  %345 = vmatpush.bf16.msra.mxu1 %v323_v10 }
  0x17   : > { %542 = vmatmul.msk.bf16.vlgmr.msra.gmra.mxu0 %vm314_vm1, %v303_v11  ;;  %v353_v12 = vld.sshfl [vmem:[#allocation1] sm:$0xff pattern:$0x73625140]  ;;  %v354_v13 = vld.sshfl [vmem:[#allocation1 + $0x8] sm:$0xff pattern:$0x73625140]  ;;  %543 = vmatmul.msk.bf16.vlgmr.msra.gmra.mxu1 %vm314_vm1, %v303_v11 }
  0x18   : > { %v360_v14 = vsel %vm359_vm2, %v353_v12, 0  ;;  %v362_v15 = vsel %vm359_vm2, %v354_v13, 0 }
  0x19   : > { %371 = vmatpush.bf16.msra.mxu2 %v360_v14  ;;  %384 = vmatpush.bf16.msra.mxu3 %v362_v15 }
  0x1c   : > { %544 = vmatmul.msk.bf16.vlgmr.msra.gmra.mxu2 %vm355_vm3, %v301_v16  ;;  %545 = vmatmul.msk.bf16.vlgmr.msra.gmra.mxu3 %vm355_vm3, %v301_v16 }
  0x80   : > { %v394_v21 = vpop.permute.xlu0 %393 }
  0x94   : > { %v334_v17 = vpop.f32.mrf.mxu0  ;;  %v347_v18 = vpop.f32.mrf.mxu1 }
  0x9c   : > { %v336_v19 = vpop.f32.mrf.mxu0  ;;  %v349_v20 = vpop.f32.mrf.mxu1 }
  0x9f   : > { %v373_v22 = vpop.f32.mrf.mxu2  ;;  %v386_v23 = vpop.f32.mrf.mxu3 }
  0xa0   : > { %v374_v24 = vadd.f32 %v373_v22, %v334_v17  ;;  %v387_v25 = vadd.f32 %v386_v23, %v347_v18 }
  0xa2   : > { %v396_v26 = vadd.f32 %v394_v21, %v374_v24  ;;  %v397_v27 = vadd.f32 %v394_v21, %v387_v25 }
  0xa4   : > { %v398_v28 = vsub.f32 0.0, %v396_v26  ;;  %v399_v29 = vsub.f32 0.0, %v397_v27 }
  0xa6   : > { %v400_v30 = vmul.f32 1.442695, %v398_v28  ;;  %v402_v31 = vmul.f32 1.442695, %v399_v29 }
  0xa7   : > { %v375_v32 = vpop.f32.mrf.mxu2  ;;  %v388_v33 = vpop.f32.mrf.mxu3 }
  0xa8   : > { %579 = vpow2.f32 %v400_v30 }
  0xa9   : > { %581 = vpow2.f32 %v402_v31 }
  0xae   : > { %v580_v34 = vpop.eup %579 }
  0xaf   : > { %v582_v35 = vpop.eup %581  ;;  %v404_v36 = vadd.f32 1.0, %v580_v34 }
  0xb0   : > { %v405_v37 = vadd.f32 1.0, %v582_v35 }
  0xb1   : > { %583 = vrcp.f32 %v404_v36 }
  0xb2   : > { %585 = vrcp.f32 %v405_v37 }
  0xb7   : > { %v584_v38 = vpop.eup %583 }
  0xb8   : > { %v586_v39 = vpop.eup %585  ;;  %v408_v40 = vmul.f32 %v584_v38, %v396_v26 }
  0xb9   : > { %v409_v41 = vmul.f32 %v586_v39, %v397_v27 }
  0xbb   : > { %v410_v42 = vpack.c.bf16 %v409_v41, %v408_v40 }
  0xbd   : > { %v412_v43 = vrot.slane %v410_v42, 2 }
  0xbf   : > { %v415_v44 = vsel %vm359_vm2, %v410_v42, %v412_v43 }
  0xc0   : > { %417 = vst [vmem:[%s298_s13] sm:$0xf] %v415_v44 }
  0xc1 PF: > { %s15_s20 = sadd.s32 1, %s609_s20   ;;  %s704_s18 = smov %s605_s19 }
  0xc2   : > { %p12_p5 = scmp.ge.s32.totalorder %s15_s20, 4   ;;  %s705_s19 = smov %s707_s21 }
  0xc4   :  { %14 = sbr.rel (!%p12_p5) target bundleno = 2 (0x2), region = 73 }

// kernel: sppfcspc_forward.15
= control target key start
LH: loop header
LB: loop body
LE: loop exit
PB: predicated region body
PF: predicated region fallthrough
CT: control target
= control target key end

     0   :  { %s622_s18 = smov 0   ;;  %s624_s19 = smov 0   ;;  %s675_s0 = inlined_call_operand.vmem [shape: bf16[2,4,256], index: 0, kind: input, shape index: {}]   ;;  %s676_s1 = inlined_call_operand.vmem [shape: bf16[2,4,256], index: 1, kind: input, shape index: {}]   ;;  %s677_s2 = inlined_call_operand.vmem [shape: bf16[4,4], index: 2, kind: input, shape index: {}]   ;;  %s678_s3 = inlined_call_operand.vmem [shape: bf16[4,4], index: 3, kind: input, shape index: {}]   ;;  %s679_s4 = inlined_call_operand.vmem [shape: f32[4,1], index: 4, kind: input, shape index: {}]   ;;  %s680_s5 = inlined_call_operand.vmem [shape: f32[2,4,256], index: 5, kind: output, shape index: {}]  }
   0x1   :  { %s626_s20 = smov 0  }
   0x2 LB: > { %s27_s21 = sadd.s32 1, %s585_s19  ;;  %p517_p0 = scmp.ge.s32.totalorder %s589_s20, 1  ;;  %s589_s20 = sphi %s626_s20, %s15_s20   ;;  %s585_s19 = sphi %s624_s19, %s682_s19   ;;  %s581_s18 = sphi %s622_s18, %s681_s18  }
   0x3   : > { %p29_p1 = scmp.ge.s32.totalorder %s27_s21, 2  ;;  %p225_p2 = scmp.lt.s32.totalorder %s589_s20, 3 }
   0x5   : > { %s684_s21 = smov (%p29_p1, %s27_s21), 0  ;;  %p226_p3 = pnand %p517_p0, %p225_p2 }
   0x6   : > { %p271_p4 = scmp.lt.s32.totalorder (!%p226_p3), %s581_s18, 1 }
   0x7   : > { %229 = sbr.rel (%p226_p3) target bundleno = 199 (0xc7), region = 40 }
   0xc   : > { %v591_v0 = vmov 0   ;;  %v381_v1 = vld [vmem:[%s679_s4] sm:$0xf]  ;;  %s686_s18 = smov (!%p271_p4, %s581_s18), 1  ;;  %vm313_vm0 = vcmask 1041408   ;;  %vm309_vm1 = vcmask 31744  }
   0xd   : > { %558 = vset.pattern.permute.xlu0 %v591_v0  ;;  %s530_s24 = sshll.u32 %s686_s18, 2  ;;  %v303_v8 = vld [vmem:[%s678_s3] sm:$0x3]  ;;  %s532_s10 = sshll.u32 %s686_s18, 3  ;;  %vm404_vm2 = vcmask 1043456  }
   0xe   : > { %384 = vperm.xlu0 %558, %v381_v1   ;;  %s288_s27 = scalar_lea.vmem %s676_s1, %s530_s24  ;;  %s278_s30 = scalar_lea.vmem %s675_s0, %s530_s24  ;;  %v301_v13 = vld [vmem:[%s677_s2] sm:$0x3] }
   0xf   : > { %v304_v2 = vld [vmem:[%s288_s27] sm:$0xf]  ;;  %s298_s13 = scalar_lea.vmem %s680_s5, %s532_s10 }
  0x10   : > { %306 = vst [vmem:[#allocation1] ss:$4 sm:$0xff] %v304_v2  ;;  %v302_v3 = vld [vmem:[%s278_s30] sm:$0xf] }
  0x17   : > { %v308_v4 = vld.sshfl [vmem:[#allocation1 + $0x8] sm:$0xff pattern:$0x73625140]  ;;  %v307_v5 = vld.sshfl [vmem:[#allocation1] sm:$0xff pattern:$0x73625140] }
  0x18   : > { %v316_v6 = vsel %vm313_vm0, %v308_v4, 0  ;;  %v314_v7 = vsel %vm313_vm0, %v307_v5, 0  ;;  %345 = vst [vmem:[#allocation1] ss:$4 sm:$0xff] %v302_v3 }
  0x19   : > { %338 = vmatpush.bf16.msra.mxu1 %v316_v6  ;;  %325 = vmatpush.bf16.msra.mxu0 %v314_v7 }
  0x1c   : > { %525 = vmatmul.msk.bf16.vlgmr.msra.gmra.mxu1 %vm309_vm1, %v303_v8  ;;  %524 = vmatmul.msk.bf16.vlgmr.msra.gmra.mxu0 %vm309_vm1, %v303_v8 }
  0x1f   : > { %v346_v9 = vld.sshfl [vmem:[#allocation1] sm:$0xff pattern:$0x73625140]  ;;  %v347_v10 = vld.sshfl [vmem:[#allocation1 + $0x8] sm:$0xff pattern:$0x73625140] }
  0x20   : > { %v351_v11 = vsel %vm313_vm0, %v346_v9, 0  ;;  %v353_v12 = vsel %vm313_vm0, %v347_v10, 0 }
  0x21   : > { %362 = vmatpush.bf16.msra.mxu2 %v351_v11  ;;  %375 = vmatpush.bf16.msra.mxu3 %v353_v12 }
  0x24   : > { %526 = vmatmul.msk.bf16.vlgmr.msra.gmra.mxu2 %vm309_vm1, %v301_v13  ;;  %527 = vmatmul.msk.bf16.vlgmr.msra.gmra.mxu3 %vm309_vm1, %v301_v13 }
  0x80   : > { %v385_v18 = vpop.permute.xlu0 %384 }
  0x99   : > { %v340_v14 = vpop.f32.mrf.mxu1  ;;  %v327_v15 = vpop.f32.mrf.mxu0 }
  0xa1   : > { %v342_v16 = vpop.f32.mrf.mxu1  ;;  %v329_v17 = vpop.f32.mrf.mxu0 }
  0xa7   : > { %v364_v19 = vpop.f32.mrf.mxu2  ;;  %v377_v20 = vpop.f32.mrf.mxu3 }
  0xa8   : > { %v365_v21 = vadd.f32 %v364_v19, %v327_v15  ;;  %v378_v22 = vadd.f32 %v377_v20, %v340_v14 }
  0xaa   : > { %v387_v23 = vadd.f32 %v385_v18, %v365_v21  ;;  %v388_v24 = vadd.f32 %v385_v18, %v378_v22 }
  0xac   : > { %v389_v25 = vsub.f32 0.0, %v387_v23  ;;  %v390_v26 = vsub.f32 0.0, %v388_v24 }
  0xae   : > { %v391_v27 = vmul.f32 1.442695, %v389_v25  ;;  %v393_v28 = vmul.f32 1.442695, %v390_v26 }
  0xaf   : > { %v366_v29 = vpop.f32.mrf.mxu2  ;;  %v379_v30 = vpop.f32.mrf.mxu3 }
  0xb0   : > { %559 = vpow2.f32 %v391_v27 }
  0xb1   : > { %561 = vpow2.f32 %v393_v28 }
  0xb6   : > { %v560_v31 = vpop.eup %559 }
  0xb7   : > { %v562_v32 = vpop.eup %561  ;;  %v395_v33 = vadd.f32 1.0, %v560_v31 }
  0xb8   : > { %v396_v34 = vadd.f32 1.0, %v562_v32 }
  0xb9   : > { %563 = vrcp.f32 %v395_v33 }
  0xba   : > { %565 = vrcp.f32 %v396_v34 }
  0xbf   : > { %v564_v35 = vpop.eup %563 }
  0xc0   : > { %v566_v36 = vpop.eup %565  ;;  %v399_v38 = vmul.f32 %v564_v35, %v387_v23 }
  0xc1   : > { %v400_v37 = vmul.f32 %v566_v36, %v388_v24 }
  0xc3   : > { %v403_v39 = vrot.slane %v400_v37, 4 }
  0xc5   : > { %v405_v40 = vsel %vm404_vm2, %v399_v38, %v403_v39 }
  0xc6   : > { %407 = vst [vmem:[%s298_s13] sm:$0xff] %v405_v40 }
  0xc7 PF: > { %s15_s20 = sadd.s32 1, %s589_s20   ;;  %s681_s18 = smov %s585_s19 }
  0xc8   : > { %p12_p5 = scmp.ge.s32.totalorder %s15_s20, 4   ;;  %s682_s19 = smov %s684_s21 }
  0xca   :  { %14 = sbr.rel (!%p12_p5) target bundleno = 2 (0x2), region = 73 }

</bundles_post_ra>
